<compile_context>
chip_gen: v6e
topology: v6e:2x2x1
jax: 0.10.0
libtpu: 0.0.40
codegen_flags: <defaults>
</compile_context>

<pallas_src>
import functools

import jax
import jax.numpy as jnp
import numpy as np
from jax.experimental import pallas as pl
from jax.experimental.pallas import tpu as pltpu

K = 7          # spatial-attention kernel size
PAD = K // 2   # padding = 3


def cbam_kernel(x_ref, w1_ref, w2t_ref, cmat_ref, o_ref, *, hw_true):
    # x_ref:    (Bb, C, HWp)   VMEM, lane-dense (zero-padded) spatial axis
    # w1_ref:   (Cr, C)        VMEM  (fc1 1x1-conv weight)
    # w2t_ref:  (Cr, C)        VMEM  (fc2 1x1-conv weight, transposed)
    # cmat_ref: (2*HWp, HWp)   VMEM  (7x7 conv folded to a dense matrix)
    # o_ref:    (Bb, C, HWp)   VMEM
    _, C, hw_pad = x_ref.shape

    x = x_ref[...]                                               # input dtype

    # ---------------- Channel attention (pools + tiny MLP, VPU only) ----------
    inv_hw = 1.0 / float(hw_true)
    avg = jnp.sum(x, axis=-1, dtype=jnp.float32) * inv_hw        # (Bb, C)
    if hw_pad != hw_true:
        lane = jax.lax.broadcasted_iota(jnp.int32, (1, 1, hw_pad), 2)
        x_for_max = jnp.where(lane < hw_true, x, jnp.finfo(x.dtype).min)
    else:
        x_for_max = x
    mx = jnp.max(x_for_max, axis=-1).astype(jnp.float32)         # (Bb, C)

    w1 = w1_ref[...].astype(jnp.float32)                         # (Cr, C)
    w2t = w2t_ref[...].astype(jnp.float32)                       # (Cr, C)

    # fc2(relu(fc1(avg))) + fc2(relu(fc1(max))) == fc2(relu(fc1(avg)) + relu(fc1(max)))
    # Cr is tiny, so keep these contractions off the MXU (broadcast-mul + reduce).
    h = (jnp.maximum(jnp.sum(avg[:, None, :] * w1[None, :, :], axis=-1), 0.0)
         + jnp.maximum(jnp.sum(mx[:, None, :] * w1[None, :, :], axis=-1), 0.0))   # (Bb, Cr)
    ca = jax.nn.sigmoid(jnp.sum(h[:, :, None] * w2t[None, :, :], axis=1))         # (Bb, C)

    x_ca = x * ca[:, :, None].astype(x.dtype)                    # (Bb, C, HWp)

    # ---------------- Spatial attention ----------------
    inv_c = 1.0 / float(C)
    sp_avg = jnp.sum(x_ca, axis=1, dtype=jnp.float32) * inv_c    # (Bb, HWp)
    sp_max = jnp.max(x_ca, axis=1).astype(jnp.float32)           # (Bb, HWp)

    # 7x7 conv (2 -> 1 ch, padding=3) as ONE dense MXU matmul on the fused
    # [avg ; max] maps (default precision: single bf16 pass, f32 accumulation).
    lhs = jnp.concatenate([sp_avg, sp_max], axis=-1)             # (Bb, 2*HWp)
    conv = jnp.dot(lhs, cmat_ref[...], preferred_element_type=jnp.float32)  # (Bb, HWp)
    sa = jax.nn.sigmoid(conv)

    o_ref[...] = (x_ca * sa[:, None, :].astype(x_ca.dtype)).astype(o_ref.dtype)


def _conv7x7_as_matrix(wsp4, H, W, hw_pad):
    """Fold Conv2d(2, 1, 7, padding=3, bias=False) with weight wsp4 (1,2,7,7) into a
    dense M of shape (2*hw_pad, hw_pad) so that, for flattened (zero-padded) maps
    [avg ; max], conv_out_flat = [avg ; max] @ M. Pad rows/cols are zero."""
    HW = H * W
    w = np.asarray(wsp4, dtype=np.float32).reshape(2, K, K)
    hh, ww = np.meshgrid(np.arange(H), np.arange(W), indexing="ij")
    out_idx = (hh * W + ww).ravel()
    M = np.zeros((2 * hw_pad, hw_pad), np.float32)
    for ci in range(2):
        base = ci * hw_pad
        for kh in range(K):
            for kw in range(K):
                dh, dw = kh - PAD, kw - PAD
                sh, sw = hh + dh, ww + dw
                valid = ((sh >= 0) & (sh < H) & (sw >= 0) & (sw < W)).ravel()
                src = (base + np.clip(sh, 0, H - 1) * W
                       + np.clip(sw, 0, W - 1)).ravel()
                M[src[valid], out_idx[valid]] += w[ci, kh, kw]
    return jnp.asarray(M)


def _pick_block_b(N, block_image_bytes, const_bytes, vmem_budget_bytes):
    # Live per-step footprint ~ 2x input (double-buffered) + 2x output + ~2x f32 temps.
    avail = vmem_budget_bytes - const_bytes
    cap = max(1, avail // (6 * block_image_bytes))
    # Keep >= 2 grid steps when N >= 2 so the "parallel" batch axis actually gives
    # both v7x TensorCores work (harmless on v5e/v6e: 1 TC).
    target = min(cap, max(1, N // 2))
    bb = 1
    for d in range(1, N + 1):
        if N % d == 0 and d <= target:
            bb = d
    return bb


def cbam(x, w1, w2, wsp4, block_b=None, vmem_budget_bytes=24 << 20):
    """x: (N, C, H, W); w1: (C//r, C); w2: (C, C//r); wsp4: (1, 2, 7, 7)."""
    N, C, H, W = x.shape
    HW = H * W
    HWp = ((HW + 127) // 128) * 128          # lane-dense spatial axis
    Cr = w1.shape[0]

    cmat_bytes = 2 * HWp * HWp * 4
    if cmat_bytes > (8 << 20):
        # TODO(synk): for large feature maps replace the dense O(HW^2) conv fold with
        # shifted matmuls / pltpu.roll-accumulate so the weights stay O(HW*K).
        raise ValueError("dense 7x7 conv fold too large for VMEM at this feature-map size")

    # Wrapper-side layout plumbing: lane-dense (zero-padded) spatial axis,
    # transposed fc2 weight, conv folded to a dense matrix.
    x2 = x.reshape(N, C, HW)
    if HWp != HW:
        x2 = jnp.pad(x2, ((0, 0), (0, 0), (0, HWp - HW)))
    w2t = jnp.transpose(w2)                       # (Cr, C)
    cmat = _conv7x7_as_matrix(wsp4, H, W, HWp)    # (2*HWp, HWp)

    if block_b is None:
        block_b = _pick_block_b(N, C * HWp * 4, cmat_bytes + 2 * Cr * C * 4,
                                vmem_budget_bytes)
    assert N % block_b == 0, "block_b must divide N"

    kernel = functools.partial(cbam_kernel, hw_true=HW)
    compiler_params = pltpu.CompilerParams(
        dimension_semantics=("parallel",),        # independent batch blocks
        vmem_limit_bytes=32 << 20,                # >= scoped default everywhere, <= v7x's 64 MiB
    )

    def make_call(single_buffer_consts):
        const_kw = {}
        if single_buffer_consts and hasattr(pl, "Buffered"):
            const_kw = dict(pipeline_mode=pl.Buffered(1))   # constants never change block index
        in_specs = [
            pl.BlockSpec((block_b, C, HWp), lambda b: (b, 0, 0)),
            pl.BlockSpec((Cr, C), lambda b: (0, 0), **const_kw),
            pl.BlockSpec((Cr, C), lambda b: (0, 0), **const_kw),
            pl.BlockSpec((2 * HWp, HWp), lambda b: (0, 0), **const_kw),
        ]
        return pl.pallas_call(
            kernel,
            out_shape=jax.ShapeDtypeStruct((N, C, HWp), x.dtype),
            grid=(N // block_b,),
            in_specs=in_specs,
            out_specs=pl.BlockSpec((block_b, C, HWp), lambda b: (b, 0, 0)),
            compiler_params=compiler_params,
        )

    try:
        out2 = jax.block_until_ready(make_call(True)(x2, w1, w2t, cmat))
    except Exception:
        # Fallback for JAX versions without single-buffered constant support.
        out2 = make_call(False)(x2, w1, w2t, cmat)

    if HWp != HW:
        out2 = out2[:, :, :HW]
    return out2.reshape(N, C, H, W)


# ---------------- Pure-JAX reference (for validation) ----------------
def cbam_ref(x, w1, w2, wsp4):
    hp = jax.lax.Precision.HIGHEST
    avg = jnp.mean(x, axis=(2, 3), keepdims=True)
    mx = jnp.max(x, axis=(2, 3), keepdims=True)

    def mlp(v):                              # w1: (Cr, C), w2: (C, Cr)
        h = jnp.einsum('rc,nchw->nrhw', w1, v, precision=hp)
        h = jnp.maximum(h, 0.0)
        return jnp.einsum('cr,nrhw->nchw', w2, h, precision=hp)

    ca = jax.nn.sigmoid(mlp(avg) + mlp(mx))
    x = x * ca
    sp_avg = jnp.mean(x, axis=1, keepdims=True)
    sp_max = jnp.max(x, axis=1, keepdims=True)
    s = jnp.concatenate([sp_avg, sp_max], axis=1)
    conv = jax.lax.conv_general_dilated(
        s, wsp4, window_strides=(1, 1), padding=[(PAD, PAD), (PAD, PAD)],
        dimension_numbers=('NCHW', 'OIHW', 'NCHW'), precision=hp)
    return x * jax.nn.sigmoid(conv)


if __name__ == "__main__":
    N, C, H, W = 2, 32, 16, 16
    reduction = 16
    Cr = C // reduction

    key = jax.random.PRNGKey(0)
    kx, k1, k2, k3 = jax.random.split(key, 4)

    x = jax.random.normal(kx, (N, C, H, W), dtype=jnp.float32)
    # ChannelAttention: fc1 = Conv2d(C, C//r, 1, bias=False) -> weight (Cr, C, 1, 1)
    w1 = jax.random.normal(k1, (Cr, C), dtype=jnp.float32) * 0.1
    # fc2 = Conv2d(C//r, C, 1, bias=False) -> weight (C, Cr, 1, 1)
    w2 = jax.random.normal(k2, (C, Cr), dtype=jnp.float32) * 0.1
    # SpatialAttention: conv1 = Conv2d(2, 1, 7, padding=3, bias=False) -> weight (1, 2, 7, 7)
    wsp4 = jax.random.normal(k3, (1, 2, K, K), dtype=jnp.float32) * 0.1

    out = cbam(x, w1, w2, wsp4)
    out = jax.block_until_ready(out)

    ref = cbam_ref(x, w1, w2, wsp4)
    # The folded 7x7 conv now runs as a single-pass bf16 MXU matmul with f32
    # accumulation (precision=HIGHEST dropped per perf review), so the tolerance
    # is loosened vs. the f32-accurate reference; the sigmoid bounds the error.
    np.testing.assert_allclose(np.asarray(out), np.asarray(ref), atol=1e-2, rtol=1e-2)

    print("KERNEL_OK")
</pallas_src>

<mosaic_0001>
module attributes {stable_mosaic.version = 11 : i64} {
  func.func @cbam_kernel(%arg0: i32, %arg1: memref<1x32x256xf32, #tpu.memory_space<vmem>>, %arg2: memref<2x32xf32, #tpu.memory_space<vmem>>, %arg3: memref<2x32xf32, #tpu.memory_space<vmem>>, %arg4: memref<512x256xf32, #tpu.memory_space<vmem>>, %arg5: memref<1x32x256xf32, #tpu.memory_space<vmem>>) attributes {dimension_semantics = [#tpu.dimension_semantics<parallel>], iteration_bounds = array<i64: 2>, scalar_prefetch = 0 : i64, scratch_operands = 0 : i64, tpu.core_type = #tpu.core_type<tc>, window_params = [{transform_indices = @transform_0, window_bounds = array<i64: 1, 32, 256>}, {pipeline_mode = #tpu.pipeline_mode<synchronous>, transform_indices = @transform_1, window_bounds = array<i64: 2, 32>}, {pipeline_mode = #tpu.pipeline_mode<synchronous>, transform_indices = @transform_2, window_bounds = array<i64: 2, 32>}, {pipeline_mode = #tpu.pipeline_mode<synchronous>, transform_indices = @transform_3, window_bounds = array<i64: 512, 256>}, {transform_indices = @transform_4, window_bounds = array<i64: 1, 32, 256>}]} {
    %c0 = arith.constant 0 : index
    %c0_0 = arith.constant 0 : index
    %c0_1 = arith.constant 0 : index
    %0 = vector.load %arg1[%c0, %c0_0, %c0_1] : memref<1x32x256xf32, #tpu.memory_space<vmem>>, vector<1x32x256xf32>
    %cst = arith.constant dense<0.000000e+00> : vector<1x32xf32>
    %1 = vector.multi_reduction <add>, %0, %cst [2] : vector<1x32x256xf32> to vector<1x32xf32>
    %cst_2 = arith.constant 3.906250e-03 : f32
    %2 = vector.broadcast %cst_2 : f32 to vector<1x32xf32>
    %3 = arith.mulf %1, %2 : vector<1x32xf32>
    %cst_3 = arith.constant dense<0xFF800000> : vector<1x32xf32>
    %4 = vector.multi_reduction <maximumf>, %0, %cst_3 [2] : vector<1x32x256xf32> to vector<1x32xf32>
    %c0_4 = arith.constant 0 : index
    %c0_5 = arith.constant 0 : index
    %5 = vector.load %arg2[%c0_4, %c0_5] : memref<2x32xf32, #tpu.memory_space<vmem>>, vector<2x32xf32>
    %c0_6 = arith.constant 0 : index
    %c0_7 = arith.constant 0 : index
    %6 = vector.load %arg3[%c0_6, %c0_7] : memref<2x32xf32, #tpu.memory_space<vmem>>, vector<2x32xf32>
    %7 = vector.shape_cast %3 : vector<1x32xf32> to vector<1x1x32xf32>
    %8 = vector.shape_cast %5 : vector<2x32xf32> to vector<1x2x32xf32>
    %9 = vector.broadcast %7 : vector<1x1x32xf32> to vector<1x2x32xf32>
    %10 = arith.mulf %9, %8 : vector<1x2x32xf32>
    %cst_8 = arith.constant dense<0.000000e+00> : vector<1x2xf32>
    %11 = vector.multi_reduction <add>, %10, %cst_8 [2] : vector<1x2x32xf32> to vector<1x2xf32>
    %cst_9 = arith.constant 0.000000e+00 : f32
    %12 = vector.broadcast %cst_9 : f32 to vector<1x2xf32>
    %13 = arith.maximumf %11, %12 : vector<1x2xf32>
    %14 = vector.shape_cast %4 : vector<1x32xf32> to vector<1x1x32xf32>
    %15 = vector.shape_cast %5 : vector<2x32xf32> to vector<1x2x32xf32>
    %16 = vector.broadcast %14 : vector<1x1x32xf32> to vector<1x2x32xf32>
    %17 = arith.mulf %16, %15 : vector<1x2x32xf32>
    %cst_10 = arith.constant dense<0.000000e+00> : vector<1x2xf32>
    %18 = vector.multi_reduction <add>, %17, %cst_10 [2] : vector<1x2x32xf32> to vector<1x2xf32>
    %cst_11 = arith.constant 0.000000e+00 : f32
    %19 = vector.broadcast %cst_11 : f32 to vector<1x2xf32>
    %20 = arith.maximumf %18, %19 : vector<1x2xf32>
    %21 = arith.addf %13, %20 : vector<1x2xf32>
    %22 = vector.shape_cast %21 : vector<1x2xf32> to vector<1x2x1xf32>
    %23 = vector.shape_cast %6 : vector<2x32xf32> to vector<1x2x32xf32>
    %24 = vector.broadcast %22 : vector<1x2x1xf32> to vector<1x2x32xf32>
    %25 = arith.mulf %24, %23 : vector<1x2x32xf32>
    %cst_12 = arith.constant dense<0.000000e+00> : vector<1x32xf32>
    %26 = vector.multi_reduction <add>, %25, %cst_12 [1] : vector<1x2x32xf32> to vector<1x32xf32>
    %27 = arith.negf %26 : vector<1x32xf32>
    %28 = math.exp %27 : vector<1x32xf32>
    %cst_13 = arith.constant 1.000000e+00 : f32
    %29 = vector.broadcast %cst_13 : f32 to vector<1x32xf32>
    %30 = arith.addf %29, %28 : vector<1x32xf32>
    %31 = arith.divf %29, %30 : vector<1x32xf32>
    %32 = vector.shape_cast %31 : vector<1x32xf32> to vector<1x32x1xf32>
    %33 = vector.broadcast %32 : vector<1x32x1xf32> to vector<1x32x256xf32>
    %34 = arith.mulf %0, %33 : vector<1x32x256xf32>
    %cst_14 = arith.constant dense<0.000000e+00> : vector<1x256xf32>
    %35 = vector.multi_reduction <add>, %34, %cst_14 [1] : vector<1x32x256xf32> to vector<1x256xf32>
    %cst_15 = arith.constant 3.125000e-02 : f32
    %36 = vector.broadcast %cst_15 : f32 to vector<1x256xf32>
    %37 = arith.mulf %35, %36 : vector<1x256xf32>
    %cst_16 = arith.constant dense<0xFF800000> : vector<1x256xf32>
    %38 = vector.multi_reduction <maximumf>, %34, %cst_16 [1] : vector<1x32x256xf32> to vector<1x256xf32>
    %39 = tpu.concatenate %37, %38 in 1 : vector<1x256xf32>, vector<1x256xf32> -> vector<1x512xf32>
    %c0_17 = arith.constant 0 : index
    %c0_18 = arith.constant 0 : index
    %40 = vector.load %arg4[%c0_17, %c0_18] : memref<512x256xf32, #tpu.memory_space<vmem>>, vector<512x256xf32>
    %cst_19 = arith.constant dense<0.000000e+00> : vector<1x256xf32>
    %41 = tpu.matmul %39, %40, %cst_19 {dimension_numbers = #tpu.dot_dimension_numbers<[1], [0], [0], [1], [0, 0, 1, 1], [], []>} : vector<1x512xf32>, vector<512x256xf32>, vector<1x256xf32> -> vector<1x256xf32>
    %42 = arith.negf %41 : vector<1x256xf32>
    %43 = math.exp %42 : vector<1x256xf32>
    %cst_20 = arith.constant 1.000000e+00 : f32
    %44 = vector.broadcast %cst_20 : f32 to vector<1x256xf32>
    %45 = arith.addf %44, %43 : vector<1x256xf32>
    %46 = arith.divf %44, %45 : vector<1x256xf32>
    %47 = vector.shape_cast %46 : vector<1x256xf32> to vector<1x1x256xf32>
    %48 = vector.broadcast %47 : vector<1x1x256xf32> to vector<1x32x256xf32>
    %49 = arith.mulf %34, %48 : vector<1x32x256xf32>
    %c0_21 = arith.constant 0 : index
    %c0_22 = arith.constant 0 : index
    %c0_23 = arith.constant 0 : index
    %50 = vector.load %arg5[%c0_21, %c0_22, %c0_23] : memref<1x32x256xf32, #tpu.memory_space<vmem>>, vector<1x32x256xf32>
    tpu.vector_store %arg5[%c0_21, %c0_22, %c0_23], %49 {strides = array<i32>} : memref<1x32x256xf32, #tpu.memory_space<vmem>>, vector<1x32x256xf32>,
    return
  }
  func.func @transform_0(%arg0: i32) -> (i32, i32, i32) {
    %c0_i32 = arith.constant 0 : i32
    %c0_i32_0 = arith.constant 0 : i32
    %c0_i32_1 = arith.constant 0 : i32
    return %arg0, %c0_i32, %c0_i32_0 : i32, i32, i32
  }
  func.func @transform_1(%arg0: i32) -> (i32, i32) {
    %c0_i32 = arith.constant 0 : i32
    %c0_i32_0 = arith.constant 0 : i32
    %c0_i32_1 = arith.constant 0 : i32
    return %c0_i32, %c0_i32_0 : i32, i32
  }
  func.func @transform_2(%arg0: i32) -> (i32, i32) {
    %c0_i32 = arith.constant 0 : i32
    %c0_i32_0 = arith.constant 0 : i32
    %c0_i32_1 = arith.constant 0 : i32
    return %c0_i32, %c0_i32_0 : i32, i32
  }
  func.func @transform_3(%arg0: i32) -> (i32, i32) {
    %c0_i32 = arith.constant 0 : i32
    %c0_i32_0 = arith.constant 0 : i32
    %c0_i32_1 = arith.constant 0 : i32
    return %c0_i32, %c0_i32_0 : i32, i32
  }
  func.func @transform_4(%arg0: i32) -> (i32, i32, i32) {
    %c0_i32 = arith.constant 0 : i32
    %c0_i32_0 = arith.constant 0 : i32
    %c0_i32_1 = arith.constant 0 : i32
    return %arg0, %c0_i32, %c0_i32_0 : i32, i32, i32
  }
}

module attributes {stable_mosaic.version = 11 : i64} {
  func.func @cbam_kernel(%arg0: i32, %arg1: memref<1x32x256xf32, #tpu.memory_space<vmem>>, %arg2: memref<2x32xf32, #tpu.memory_space<vmem>>, %arg3: memref<2x32xf32, #tpu.memory_space<vmem>>, %arg4: memref<512x256xf32, #tpu.memory_space<vmem>>, %arg5: memref<1x32x256xf32, #tpu.memory_space<vmem>>) attributes {dimension_semantics = [#tpu.dimension_semantics<parallel>], iteration_bounds = array<i64: 2>, scalar_prefetch = 0 : i64, scratch_operands = 0 : i64, tpu.core_type = #tpu.core_type<tc>, window_params = [{transform_indices = @transform_0, window_bounds = array<i64: 1, 32, 256>}, {pipeline_mode = #tpu.pipeline_mode<synchronous>, transform_indices = @transform_1, window_bounds = array<i64: 2, 32>}, {pipeline_mode = #tpu.pipeline_mode<synchronous>, transform_indices = @transform_2, window_bounds = array<i64: 2, 32>}, {pipeline_mode = #tpu.pipeline_mode<synchronous>, transform_indices = @transform_3, window_bounds = array<i64: 512, 256>}, {transform_indices = @transform_4, window_bounds = array<i64: 1, 32, 256>}]} {
    %c0 = arith.constant 0 : index
    %c0_0 = arith.constant 0 : index
    %c0_1 = arith.constant 0 : index
    %0 = vector.load %arg1[%c0, %c0_0, %c0_1] : memref<1x32x256xf32, #tpu.memory_space<vmem>>, vector<1x32x256xf32>
    %cst = arith.constant dense<0.000000e+00> : vector<1x32xf32>
    %1 = vector.multi_reduction <add>, %0, %cst [2] : vector<1x32x256xf32> to vector<1x32xf32>
    %cst_2 = arith.constant 3.906250e-03 : f32
    %2 = vector.broadcast %cst_2 : f32 to vector<1x32xf32>
    %3 = arith.mulf %1, %2 : vector<1x32xf32>
    %cst_3 = arith.constant dense<0xFF800000> : vector<1x32xf32>
    %4 = vector.multi_reduction <maximumf>, %0, %cst_3 [2] : vector<1x32x256xf32> to vector<1x32xf32>
    %c0_4 = arith.constant 0 : index
    %c0_5 = arith.constant 0 : index
    %5 = vector.load %arg2[%c0_4, %c0_5] : memref<2x32xf32, #tpu.memory_space<vmem>>, vector<2x32xf32>
    %c0_6 = arith.constant 0 : index
    %c0_7 = arith.constant 0 : index
    %6 = vector.load %arg3[%c0_6, %c0_7] : memref<2x32xf32, #tpu.memory_space<vmem>>, vector<2x32xf32>
    %7 = vector.shape_cast %3 : vector<1x32xf32> to vector<1x1x32xf32>
    %8 = vector.shape_cast %5 : vector<2x32xf32> to vector<1x2x32xf32>
    %9 = vector.broadcast %7 : vector<1x1x32xf32> to vector<1x2x32xf32>
    %10 = arith.mulf %9, %8 : vector<1x2x32xf32>
    %cst_8 = arith.constant dense<0.000000e+00> : vector<1x2xf32>
    %11 = vector.multi_reduction <add>, %10, %cst_8 [2] : vector<1x2x32xf32> to vector<1x2xf32>
    %cst_9 = arith.constant 0.000000e+00 : f32
    %12 = vector.broadcast %cst_9 : f32 to vector<1x2xf32>
    %13 = arith.maximumf %11, %12 : vector<1x2xf32>
    %14 = vector.shape_cast %4 : vector<1x32xf32> to vector<1x1x32xf32>
    %15 = vector.shape_cast %5 : vector<2x32xf32> to vector<1x2x32xf32>
    %16 = vector.broadcast %14 : vector<1x1x32xf32> to vector<1x2x32xf32>
    %17 = arith.mulf %16, %15 : vector<1x2x32xf32>
    %cst_10 = arith.constant dense<0.000000e+00> : vector<1x2xf32>
    %18 = vector.multi_reduction <add>, %17, %cst_10 [2] : vector<1x2x32xf32> to vector<1x2xf32>
    %cst_11 = arith.constant 0.000000e+00 : f32
    %19 = vector.broadcast %cst_11 : f32 to vector<1x2xf32>
    %20 = arith.maximumf %18, %19 : vector<1x2xf32>
    %21 = arith.addf %13, %20 : vector<1x2xf32>
    %22 = vector.shape_cast %21 : vector<1x2xf32> to vector<1x2x1xf32>
    %23 = vector.shape_cast %6 : vector<2x32xf32> to vector<1x2x32xf32>
    %24 = vector.broadcast %22 : vector<1x2x1xf32> to vector<1x2x32xf32>
    %25 = arith.mulf %24, %23 : vector<1x2x32xf32>
    %cst_12 = arith.constant dense<0.000000e+00> : vector<1x32xf32>
    %26 = vector.multi_reduction <add>, %25, %cst_12 [1] : vector<1x2x32xf32> to vector<1x32xf32>
    %27 = arith.negf %26 : vector<1x32xf32>
    %28 = math.exp %27 : vector<1x32xf32>
    %cst_13 = arith.constant 1.000000e+00 : f32
    %29 = vector.broadcast %cst_13 : f32 to vector<1x32xf32>
    %30 = arith.addf %29, %28 : vector<1x32xf32>
    %31 = arith.divf %29, %30 : vector<1x32xf32>
    %32 = vector.shape_cast %31 : vector<1x32xf32> to vector<1x32x1xf32>
    %33 = vector.broadcast %32 : vector<1x32x1xf32> to vector<1x32x256xf32>
    %34 = arith.mulf %0, %33 : vector<1x32x256xf32>
    %cst_14 = arith.constant dense<0.000000e+00> : vector<1x256xf32>
    %35 = vector.multi_reduction <add>, %34, %cst_14 [1] : vector<1x32x256xf32> to vector<1x256xf32>
    %cst_15 = arith.constant 3.125000e-02 : f32
    %36 = vector.broadcast %cst_15 : f32 to vector<1x256xf32>
    %37 = arith.mulf %35, %36 : vector<1x256xf32>
    %cst_16 = arith.constant dense<0xFF800000> : vector<1x256xf32>
    %38 = vector.multi_reduction <maximumf>, %34, %cst_16 [1] : vector<1x32x256xf32> to vector<1x256xf32>
    %39 = tpu.concatenate %37, %38 in 1 : vector<1x256xf32>, vector<1x256xf32> -> vector<1x512xf32>
    %c0_17 = arith.constant 0 : index
    %c0_18 = arith.constant 0 : index
    %40 = vector.load %arg4[%c0_17, %c0_18] : memref<512x256xf32, #tpu.memory_space<vmem>>, vector<512x256xf32>
    %cst_19 = arith.constant dense<0.000000e+00> : vector<1x256xf32>
    %41 = tpu.matmul %39, %40, %cst_19 {dimension_numbers = #tpu.dot_dimension_numbers<[1], [0], [0], [1], [0, 0, 1, 1], [], []>} : vector<1x512xf32>, vector<512x256xf32>, vector<1x256xf32> -> vector<1x256xf32>
    %42 = arith.negf %41 : vector<1x256xf32>
    %43 = math.exp %42 : vector<1x256xf32>
    %cst_20 = arith.constant 1.000000e+00 : f32
    %44 = vector.broadcast %cst_20 : f32 to vector<1x256xf32>
    %45 = arith.addf %44, %43 : vector<1x256xf32>
    %46 = arith.divf %44, %45 : vector<1x256xf32>
    %47 = vector.shape_cast %46 : vector<1x256xf32> to vector<1x1x256xf32>
    %48 = vector.broadcast %47 : vector<1x1x256xf32> to vector<1x32x256xf32>
    %49 = arith.mulf %34, %48 : vector<1x32x256xf32>
    %c0_21 = arith.constant 0 : index
    %c0_22 = arith.constant 0 : index
    %c0_23 = arith.constant 0 : index
    %50 = vector.load %arg5[%c0_21, %c0_22, %c0_23] : memref<1x32x256xf32, #tpu.memory_space<vmem>>, vector<1x32x256xf32>
    tpu.vector_store %arg5[%c0_21, %c0_22, %c0_23], %49 {strides = array<i32>} : memref<1x32x256xf32, #tpu.memory_space<vmem>>, vector<1x32x256xf32>,
    return
  }
  func.func @transform_0(%arg0: i32) -> (i32, i32, i32) {
    %c0_i32 = arith.constant 0 : i32
    %c0_i32_0 = arith.constant 0 : i32
    %c0_i32_1 = arith.constant 0 : i32
    return %arg0, %c0_i32, %c0_i32_0 : i32, i32, i32
  }
  func.func @transform_1(%arg0: i32) -> (i32, i32) {
    %c0_i32 = arith.constant 0 : i32
    %c0_i32_0 = arith.constant 0 : i32
    %c0_i32_1 = arith.constant 0 : i32
    return %c0_i32, %c0_i32_0 : i32, i32
  }
  func.func @transform_2(%arg0: i32) -> (i32, i32) {
    %c0_i32 = arith.constant 0 : i32
    %c0_i32_0 = arith.constant 0 : i32
    %c0_i32_1 = arith.constant 0 : i32
    return %c0_i32, %c0_i32_0 : i32, i32
  }
  func.func @transform_3(%arg0: i32) -> (i32, i32) {
    %c0_i32 = arith.constant 0 : i32
    %c0_i32_0 = arith.constant 0 : i32
    %c0_i32_1 = arith.constant 0 : i32
    return %c0_i32, %c0_i32_0 : i32, i32
  }
  func.func @transform_4(%arg0: i32) -> (i32, i32, i32) {
    %c0_i32 = arith.constant 0 : i32
    %c0_i32_0 = arith.constant 0 : i32
    %c0_i32_1 = arith.constant 0 : i32
    return %arg0, %c0_i32, %c0_i32_0 : i32, i32, i32
  }
}

</mosaic_0001>

<bundles_post_ra>
// kernel: tpu_custom_call.1
= control target key start
LH: loop header
LB: loop body
LE: loop exit
PB: predicated region body
PF: predicated region fallthrough
CT: control target
= control target key end

     0   :  { %s1604_s0 = inlined_call_operand.hbm [shape: f32[2,32,256], index: 0, kind: input, shape index: {}]   ;;  %s1605_s1 = inlined_call_operand.hbm [shape: f32[2,32], index: 1, kind: input, shape index: {}]   ;;  %s1606_s2 = inlined_call_operand.vmem [shape: f32[2,32], index: 2, kind: input, shape index: {}]   ;;  %s1607_s3 = inlined_call_operand.hbm [shape: f32[512,256], index: 3, kind: input, shape index: {}]   ;;  %s1608_s4 = inlined_call_operand.hbm [shape: f32[2,32,256], index: 4, kind: output, shape index: {}]  }
   0x1   :  { %1613 = sst [smem:[#allocation12_spill]] %s1605_s1 }
   0x2   :  { %9 = vsyncpa [#allocation3], 0 }
   0x3   :  { %11 = vsyncpa [#allocation3 + $0x1], 0 }
   0x4   :  { %12 = vsyncpa [#allocation6], 0 }
   0x5   :  { %13 = vsyncpa [#allocation4], 0 }
   0x6   :  { %15 = vsyncpa [#allocation4 + $0x1], 0  ;;  %s1287_s15 = smov 0   ;;  %s1289_s16 = smov 0  }
   0x7   :  { %s1291_s17 = smov 0   ;;  %s1293_s18 = smov 0  }
   0x8 LB: > { %s1308_s19 = sadd.s32 4294967295, %s1251_s18   ;;  %s994_s20 = sadd.s32 4294967294, %s1251_s18   ;;  %s1251_s18 = sphi %s1293_s18, %s1633_s18   ;;  %s1247_s17 = sphi %s1291_s17, %s1632_s17   ;;  %s1243_s16 = sphi %s1289_s16, %s1631_s16   ;;  %s1239_s15 = sphi %s1287_s15, %s1630_s15  }
   0x9   : > { %s1312_s21 = sadd.s32 1, %s1251_s18   ;;  %s28_s22 = sadd.s32 1, %s1247_s17 }
   0xa   : > { %s25_s23 = ssub.s32 %s1251_s18, %s1312_s21  ;;  %p35_p0 = scmp.ne.s32.totalorder %s1247_s17, %s1243_s16 }
   0xb   : > { %p26_p1 = scmp.eq.s32.totalorder %s25_s23, 0  ;;  %p36_p2 = scmp.eq.s32.totalorder %s1251_s18, 0 }
   0xc   : > { %p41_p3 = scmp.ne.s32.totalorder %s1243_s16, %s1239_s15  ;;  %p1609_p4 = scmp.eq.s32.totalorder %s1308_s19, 0 }
   0xd   : > { %s1324_s24 = scalar_select %p26_p1, %s1247_s17, %s28_s22  }
   0xe   : > { %p1326_p5 = por %p36_p2, %p35_p0  ;;  %p1332_p6 = por %p1609_p4, %p41_p3 }
   0xf   : > { %p128_p7 = scmp.eq.s32.totalorder %s1308_s19, 1  ;;  %p134_p8 = scmp.eq.s32.totalorder %s994_s20, 1 }
  0x10   : > { %s1615_s26 = scalar_select %p1332_p6, 1, 0 }
  0x11   : > { %p995_p9 = scmp.ge.s32.totalorder %s1251_s18, 1  ;;  %p141_p10 = scmp.lt.s32.totalorder %s1251_s18, 3 }
  0x12   : > { %p1339_p11 = por %p128_p7, %p35_p0  ;;  %p1343_p12 = por %p134_p8, %p41_p3 }
  0x13   : > { %p1347_p13 = pnand %p995_p9, %p141_p10  ;;  %s1253_s30 = smov [#allocation5]  }
  0x14   : > { %s1616_s27 = scalar_select %p1339_p11, 1, 0 }
  0x15   : > { %s1617_s28 = scalar_select %p1343_p12, 1, 0 }
  0x16   : > { %s1618_s29 = scalar_select %p1347_p13, 1, 0 }
  0x17   : > { %p1029_p2 = pneg %p1347_p13  ;;  %s154_s5 = sshll.u32 %s1253_s30, 4  ;;  %s155_s5 = int_to_ptr.vmem [resolvable:$true] %s154_s5 }
  0x18   : > { %p1046_p4 = scmp.lt.s32.totalorder %s1251_s18, 2  ;;  %p1619_p0 = scmp.eq.s32.totalorder %s1308_s19, 0 }
  0x19   : > { %s1254_s8 = smov [#allocation7]   ;;  %s1114_s10 = scalar_lea.vmem %s155_s5, 32 }
  0x1a   : > { %p1357_p7 = pnand %p1029_p2, %p1619_p0  ;;  %p1363_p3 = pnand %p1046_p4, %p1326_p5 }
  0x1b   : > { %s167_s9 = sshll.u32 %s1254_s8, 4  ;;  %p1115_p9 = scmp.ne.s32.totalorder %s155_s5, %s1114_s10  ;;  %s168_s9 = int_to_ptr.vmem [resolvable:$true] %s167_s9 }
  0x1c   : > { %p1105_p8 = pneg %p1357_p7  ;;  %p1122_p0 = scmp.lt.s32.totalorder %s155_s5, %s155_s5 }
  0x1d   : > { %p1123_p1 = scmp.lt.s32.totalorder %s1114_s10, %s1114_s10 }
  0x1e   : > { %p1117_p10 = pnand %p1115_p9, %p1105_p8 }
  0x1f   : > { %p1124_p12 = por %p1123_p1, %p1122_p0 }
  0x20   : > { %p1118_p2 = pneg %p1117_p10 }
  0x22   : > { %p1125_p11 = pnand %p1124_p12, %p1118_p2 }
  0x24   : > { %1128 = shalt.err (!%p1125_p11)
}
  0x25   : > { %s1622_s1 = sld [smem:[#allocation12_spill]]  ;;  %s181_s13 = sand.u32 1, %s1247_s17  }
  0x26   : > { %s1140_s14 = scalar_lea.vmem %s168_s9, 16384  ;;  %p1148_p10 = scmp.lt.s32.totalorder %s168_s9, %s168_s9 }
  0x27   : > { %p1141_p4 = scmp.ne.s32.totalorder %s168_s9, %s1140_s14  ;;  %p1149_p6 = scmp.lt.s32.totalorder %s1140_s14, %s1140_s14 }
  0x29   : > { %p1143_p5 = pnand %p1141_p4, %p1105_p8  ;;  %p1150_p1 = por %p1149_p6, %p1148_p10 }
  0x2b   : > { %1032 = dma.hbm_to_vmem [thread:$0]  (!%p1357_p7), %s1622_s1, 32, %s155_s5, [#allocation6]  }
  0x2c   : > { %p1144_p9 = pneg %p1143_p5 }
  0x2e   : > { %p1151_p12 = pnand %p1150_p1, %p1144_p9 }
  0x30   : > { %1154 = shalt.err (!%p1151_p12)
}
  0x31   : > { %s1255_s20 = smov 256   ;;  %s1256_s22 = smov 16  }
  0x32   : > { %1035 = dma.hbm_to_vmem [thread:$0]  (!%p1357_p7), %s1607_s3, 16384, %s168_s9, [#allocation6], %s1255_s20, %s1255_s20, %s1256_s22  }
  0x33   : > { %s999_s30 = sshll.u32 %s181_s13, 6  ;;  %s1015_s5 = sshll.u32 %s1251_s18, 10 }
  0x34   : > { %s1393_s11 = scalar_lea.hbm %s1604_s0, %s1015_s5  ;;  %s185_s12 = scalar_lea.vmem [#allocation2], %s999_s30 }
  0x35   : > { %s192_s14 = sshll.u32 %s185_s12, 4  ;;  %s1397_s6 = scalar_lea.sflag [#allocation3], %s181_s13  ;;  %s1395_s14 = int_to_ptr.vmem [resolvable:$true] %s192_s14 }
  0x36   : > { %s1155_s1 = scalar_lea.hbm %s1393_s11, 1024  ;;  %p1157_p11 = pneg %p1363_p3 }
  0x37   : > { %p1156_p6 = scmp.ne.s32.totalorder %s1393_s11, %s1155_s1  ;;  %s1160_s25 = scalar_lea.hbm %s1604_s0, 2048 }
  0x38   : > { %p1161_p2 = scmp.lt.s32.totalorder %s1393_s11, %s1604_s0  ;;  %p1162_p0 = scmp.lt.s32.totalorder %s1160_s25, %s1155_s1 }
  0x39   : > { %p1158_p7 = pnand %p1157_p11, %p1156_p6 }
  0x3a   : > { %p1163_p4 = por %p1162_p0, %p1161_p2 }
  0x3b   : > { %p1159_p8 = pneg %p1158_p7 }
  0x3d   : > { %p1164_p5 = pnand %p1163_p4, %p1159_p8 }
  0x3f   : > { %1167 = shalt.err (!%p1164_p5)
}
  0x40   : > { %s1168_s13 = scalar_lea.vmem %s1395_s14, 1024  ;;  %s1257_s30 = smov [#allocation2]  }
  0x41   : > { %p1169_p9 = scmp.ne.s32.totalorder %s1395_s14, %s1168_s13  ;;  %s1173_s10 = sshll.u32 %s1257_s30, 4  ;;  %s1174_s10 = int_to_ptr.vmem [resolvable:$false] %s1173_s10 }
  0x42   : > { %s1175_s12 = scalar_lea.vmem %s1174_s10, 2048  ;;  %p1176_p12 = scmp.lt.s32.totalorder %s1395_s14, %s1174_s10 }
  0x43   : > { %p1171_p10 = pnand %p1169_p9, %p1157_p11  ;;  %p1177_p6 = scmp.lt.s32.totalorder %s1175_s12, %s1168_s13 }
  0x45   : > { %p1172_p1 = pneg %p1171_p10  ;;  %p1178_p7 = por %p1177_p6, %p1176_p12 }
  0x47   : > { %p1179_p13 = pnand %p1178_p7, %p1172_p1 }
  0x49   : > { %1182 = shalt.err (!%p1179_p13)
}
  0x4a   : > { %1039 = dma.hbm_to_vmem [thread:$0]  (!%p1363_p3), %s1393_s11, 1024, %s1395_s14, %s1397_s6, %s1255_s20, %s1255_s20, %s1256_s22  }
  0x4b   : > { %p1623_p11 = scmp.ne.s32.totalorder %s1618_s29, 0 }
  0x4c   : > { %s1424_s1 = sand.u32 (!%p1623_p11), 1, %s1243_s16   ;;  %p1624_p13 = scmp.ne.s32.totalorder (!%p1623_p11), %s1615_s26, 0 }
  0x4d   : > { %204 = sbr.rel (%p1623_p11) target bundleno = 984 (0x3d8), region = 36  ;;  %s1003_s9 = sshll.u32 (!%p1623_p11), %s1424_s1, 6 }
  0x4e   : > { %s207_s23 = scalar_lea.sflag (!%p1623_p11), [#allocation3], %s1424_s1  ;;  %s210_s7 = scalar_lea.vmem (!%p1623_p11), [#allocation2], %s1003_s9 }
  0x52   : > { %1226 = dma.done.wait (%p1624_p13), %s207_s23, 1024  }
  0x53   : > { %1228 = vsyncadd (%p1624_p13), %s207_s23, 4294966272  ;;  %p1625_p3 = scmp.eq.s32.totalorder %s1308_s19, 0 }
  0x55   : > { %1230 = dma.done.wait (%p1625_p3), [#allocation6], 16416   ;;  %p1626_p8 = pmov %p1625_p3 }
  0x56   : > { %v1438_v0 = vld [vmem:[%s210_s7 + $0x20] sm:$0xff]  ;;  %v1440_v1 = vld [vmem:[%s210_s7 + $0x28] sm:$0xff]  ;;  %v1448_v5 = vld [vmem:[%s210_s7 + $0x30] sm:$0xff]  ;;  %v282_v16 = vlaneseq  ;;  %v1258_v22 = vmov 0   ;;  %vm379_vm0 = vcmask 130112   ;;  %vm386_vm1 = vcmask 195712  }
  0x57   : > { %1232 = vsyncadd (%p1626_p8), [#allocation6], 4294950880  ;;  %v1442_v2 = vld [vmem:[%s210_s7] sm:$0xff]  ;;  %v257_v3 = vadd.f32 %v1440_v1, %v1438_v0  ;;  %v1446_v4 = vld [vmem:[%s210_s7 + $0x8] sm:$0xff]  ;;  %v273_v15 = vmax.f32 %v1438_v0, %v1440_v1  ;;  %1090 = vset.pattern.permute.xlu0 %v1258_v22  ;;  %1089 = vset.pattern.permute.xlu1 %v1258_v22  ;;  %vm393_vm2 = vcmask 261312   ;;  %vm414_vm3 = vcmask 1041409  }
  0x58   : > { %v1450_v6 = vld [vmem:[%s210_s7 + $0x38] sm:$0xff]  ;;  %v251_v7 = vadd.f32 %v1446_v4, %v1442_v2  ;;  %v1454_v8 = vld [vmem:[%s210_s7 + $0x10] sm:$0xff]  ;;  %v267_v13 = vmax.f32 %v1442_v2, %v1446_v4  ;;  %v1471_v17 = vshrl.u32 %v282_v16, 7  ;;  %v279_v19 = vld [vmem:[#allocation5] sm:$0x3]  ;;  %vm417_vm4 = vcmask 254976  }
  0x59   : > { %v1456_v9 = vld [vmem:[%s210_s7 + $0x18] sm:$0xff]  ;;  %258 = vadd.xlane.f32.xlu1 %v257_v3  ;;  %v260_v10 = vadd.f32 %v1450_v6, %v1448_v5  ;;  %v276_v14 = vmax.f32 %v1448_v5, %v1450_v6  ;;  %s1016_s20 = sshll.u32 %s1308_s19, 10  ;;  %s242_s22 = scalar_lea.vmem [#allocation8], %s1003_s9 }
  0x5a   : > { %252 = vadd.xlane.f32.xlu0 %v251_v7  ;;  %v254_v11 = vadd.f32 %v1456_v9, %v1454_v8  ;;  %v270_v12 = vmax.f32 %v1454_v8, %v1456_v9  ;;  %v1474_v18 = vsub.s32 0, %v1471_v17  ;;  %v303_v21 = vsub.s32 1, %v1471_v17  ;;  %s902_s11 = sshll.u32 %s242_s22, 4  ;;  %s1555_s6 = scalar_lea.hbm %s1608_s4, %s1016_s20  ;;  %s1557_s11 = int_to_ptr.vmem [resolvable:$true] %s902_s11 }
  0x5b   : > { %s889_s25 = scalar_lea.sflag [#allocation4], %s1424_s1  ;;  %s1183_s5 = scalar_lea.vmem %s1557_s11, 1024 }
  0x5c   : > { %v285_v20 = vrot.slane %v279_v19, %v1474_v18  ;;  %v304_v23 = vrot.slane %v279_v19, %v303_v21  ;;  %p1184_p2 = scmp.ne.s32.totalorder %s1557_s11, %s1183_s5  ;;  %p1627_p0 = scmp.ne.s32.totalorder %s1616_s27, 0 }
  0x5d   : > { %261 = vadd.xlane.f32.xlu1 %v260_v10  ;;  %s1259_s8 = smov [#allocation8]  }
  0x5e   : > { %255 = vadd.xlane.f32.xlu0 %v254_v11  ;;  %v369_v11 = vand.u32 127, %v282_v16  ;;  %p1185_p4 = pnand %p1184_p2, %p1627_p0  ;;  %s1187_s13 = sshll.u32 %s1259_s8, 4  ;;  %s1188_s13 = int_to_ptr.vmem [resolvable:$false] %s1187_s13 }
  0x5f   : > { %s1189_s30 = scalar_lea.vmem %s1188_s13, 2048  ;;  %p1190_p9 = scmp.lt.s32.totalorder %s1557_s11, %s1188_s13 }
  0x60   : > { %v381_v19 = vadd.s32 4294967280, %v369_v11  ;;  %v372_v22 = vsub.s32 %v369_v11, %v1471_v17  ;;  %p1186_p5 = pneg %p1185_p4  ;;  %p1191_p10 = scmp.lt.s32.totalorder %s1189_s30, %s1183_s5 }
  0x61   : > { %271 = vmax.xlane.f32.xlu1 %v270_v12 }
  0x62   : > { %268 = vmax.xlane.f32.xlu0 %v267_v13  ;;  %p1192_p1 = por %p1191_p10, %p1190_p9 }
  0x64   : > { %p1193_p12 = pnand %p1192_p1, %p1186_p5 }
  0x65   : > { %277 = vmax.xlane.f32.xlu1 %v276_v14  ;;  %v374_v14 = vadd.s32 4294967288, %v369_v11 }
  0x66   : > { %274 = vmax.xlane.f32.xlu0 %v273_v15  ;;  %v388_v15 = vadd.s32 4294967272, %v369_v11  ;;  %v611_v11 = vld [vmem:[#allocation7 + $0xe8] sm:$0xff] }
  0x76   : > { %291 = vbcast.lane.b32.xlu1 %v285_v20, 264 }
  0x7a   : > { %306 = vbcast.lane.b32.xlu1 %v304_v23, 256 }
  0x7c   : > { %287 = vbcast.lane.b32.xlu0 %v285_v20, 256 }
  0x7e   : > { %310 = vbcast.lane.b32.xlu1 %v304_v23, 264 }
  0x80   : > { %295 = vbcast.lane.b32.xlu0 %v285_v20, 272 }
  0x82   : > { %314 = vbcast.lane.b32.xlu1 %v304_v23, 272 }
  0x84   : > { %299 = vbcast.lane.b32.xlu0 %v285_v20, 280 }
  0x86   : > { %318 = vbcast.lane.b32.xlu1 %v304_v23, 280  ;;  %v377_v23 = vsub.s32 %v374_v14, %v1471_v17  ;;  %v672_v14 = vld [vmem:[#allocation7 + $0x2d0] sm:$0xff] }
  0xe2   : > { %v259_v24 = vpop.xlane.xlu1 %258 }
  0xe3   : > { %v253_v25 = vpop.xlane.xlu0 %252  ;;  %v265_v49 = vmul.f32 0.00390625, %v259_v24  ;;  %v391_v24 = vsub.s32 %v388_v15, %v1471_v17  ;;  %v609_v15 = vld [vmem:[#allocation7 + $0xd8] sm:$0xff] }
  0xe4   : > { %v263_v46 = vmul.f32 0.00390625, %v253_v25  ;;  %v384_v25 = vsub.s32 %v381_v19, %v1471_v17  ;;  %v671_v19 = vld [vmem:[#allocation7 + $0x2c8] sm:$0xff] }
  0xe6   : > { %v262_v26 = vpop.xlane.xlu1 %261 }
  0xe7   : > { %v256_v27 = vpop.xlane.xlu0 %255  ;;  %v266_v53 = vmul.f32 0.00390625, %v262_v26 }
  0xe8   : > { %v264_v42 = vmul.f32 0.00390625, %v256_v27 }
  0xea   : > { %v272_v28 = vpop.xlane.xlu1 %271 }
  0xeb   : > { %v269_v29 = vpop.xlane.xlu0 %268 }
  0xee   : > { %v278_v30 = vpop.xlane.xlu1 %277 }
  0xef   : > { %v275_v31 = vpop.xlane.xlu0 %274 }
  0xf2   : > { %v292_v32 = vpop.permute.xlu1 %291 }
  0xf3   : > { %v423_v33 = vmul.f32 %v292_v32, %v272_v28  ;;  %v288_v34 = vpop.permute.xlu0 %287  ;;  %v329_v45 = vmul.f32 %v292_v32, %v264_v42 }
  0xf4   : > { %v422_v35 = vmul.f32 %v288_v34, %v269_v29  ;;  %v328_v47 = vmul.f32 %v288_v34, %v263_v46 }
  0xf5   : > { %442 = vperm.xlu0 %1090, %v423_v33  }
  0xf6   : > { %439 = vperm.xlu1 %1089, %v422_v35   ;;  %v307_v36 = vpop.permute.xlu1 %306 }
  0xf7   : > { %v426_v37 = vmul.f32 %v307_v36, %v269_v29  ;;  %v296_v38 = vpop.permute.xlu0 %295  ;;  %v332_v48 = vmul.f32 %v307_v36, %v263_v46 }
  0xf8   : > { %v424_v41 = vmul.f32 %v296_v38, %v275_v31  ;;  %v330_v51 = vmul.f32 %v296_v38, %v265_v49 }
  0xfa   : > { %451 = vperm.xlu1 %1089, %v426_v37   ;;  %v311_v39 = vpop.permute.xlu1 %310 }
  0xfb   : > { %v427_v40 = vmul.f32 %v311_v39, %v272_v28  ;;  %v333_v50 = vmul.f32 %v311_v39, %v264_v42  ;;  %v300_v52 = vpop.permute.xlu0 %299 }
  0xfc   : > { %v331_v55 = vmul.f32 %v300_v52, %v266_v53  ;;  %v425_v58 = vmul.f32 %v300_v52, %v278_v30 }
  0xfd   : > { %454 = vperm.xlu0 %1090, %v427_v40  }
  0xfe   : > { %445 = vperm.xlu1 %1089, %v424_v41   ;;  %v315_v43 = vpop.permute.xlu1 %314 }
  0xff   : > { %v428_v44 = vmul.f32 %v315_v43, %v275_v31  ;;  %v334_v54 = vmul.f32 %v315_v43, %v265_v49 }
 0x101   : > { %457 = vperm.xlu0 %1090, %v428_v44  }
 0x102   : > { %348 = vperm.xlu1 %1089, %v329_v45   ;;  %v319_v56 = vpop.permute.xlu1 %318 }
 0x103   : > { %v335_v57 = vmul.f32 %v319_v56, %v266_v53  ;;  %v429_v59 = vmul.f32 %v319_v56, %v278_v30 }
 0x105   : > { %345 = vperm.xlu0 %1090, %v328_v47  }
 0x106   : > { %357 = vperm.xlu1 %1089, %v332_v48  }
 0x109   : > { %360 = vperm.xlu0 %1090, %v333_v50  }
 0x10a   : > { %351 = vperm.xlu1 %1089, %v330_v51  }
 0x10d   : > { %363 = vperm.xlu0 %1090, %v334_v54  }
 0x10e   : > { %354 = vperm.xlu1 %1089, %v331_v55  }
 0x111   : > { %366 = vperm.xlu0 %1090, %v335_v57  }
 0x112   : > { %448 = vperm.xlu1 %1089, %v425_v58  }
 0x115   : > { %460 = vperm.xlu0 %1090, %v429_v59  }
 0x170   : > { %v443_v61 = vpop.permute.xlu0 %442 }
 0x171   : > { %v440_v60 = vpop.permute.xlu1 %439  ;;  %v469_v35 = vrot.slane %v443_v61, %v377_v23  ;;  %v677_v61 = vld [vmem:[#allocation7 + $0x2f8] sm:$0xff] }
 0x172   : > { %v465_v34 = vrot.slane %v440_v60, %v372_v22  ;;  %781 = vmatprep.subr.mxu1 %v677_v61  ;;  %v586_v61 = vld [vmem:[#allocation7 + $0x20] sm:$0xff] }
 0x174   : > { %v470_v51 = vsel %vm379_vm0, %v469_v35, %v465_v34  ;;  %v600_v34 = vld [vmem:[#allocation7 + $0x90] sm:$0xff]  ;;  %v663_v35 = vld [vmem:[#allocation7 + $0x288] sm:$0xff] }
 0x175   : > { %v452_v62 = vpop.permute.xlu1 %451 }
 0x176   : > { %v484_v45 = vrot.slane %v452_v62, %v372_v22  ;;  %v676_v62 = vld [vmem:[#allocation7 + $0x2f0] sm:$0xff] }
 0x177   : > { %782 = vmatpush1.msra.mxu1 %v676_v62  ;;  %v649_v62 = vld [vmem:[#allocation7 + $0x218] sm:$0xff] }
 0x178   : > { %v455_v63 = vpop.permute.xlu0 %454 }
 0x179   : > { %v446_v3 = vpop.permute.xlu1 %445  ;;  %v488_v37 = vrot.slane %v455_v63, %v377_v23  ;;  %v613_v63 = vld [vmem:[#allocation7 + $0xf8] sm:$0xff] }
 0x17a   : > { %v474_v41 = vrot.slane %v446_v3, %v384_v25  ;;  %710 = vmatprep.subr.mxu0 %v613_v63  ;;  %v675_v3 = vld [vmem:[#allocation7 + $0x2e8] sm:$0xff]  ;;  %v585_v63 = vld [vmem:[#allocation7 + $0x18] sm:$0xff] }
 0x17b   : > { %v489_v52 = vsel %vm379_vm0, %v488_v37, %v484_v45  ;;  %783 = vmatprep.subr.mxu1 %v675_v3  ;;  %v662_v37 = vld [vmem:[#allocation7 + $0x280] sm:$0xff]  ;;  %v648_v3 = vld [vmem:[#allocation7 + $0x210] sm:$0xff] }
 0x17c   : > { %v458_v7 = vpop.permute.xlu0 %457  ;;  %v475_v55 = vsel %vm386_vm1, %v474_v41, %v470_v51  ;;  %v596_v41 = vld [vmem:[#allocation7 + $0x70] sm:$0xff]  ;;  %v594_v45 = vld [vmem:[#allocation7 + $0x60] sm:$0xff]  ;;  %v591_v51 = vld [vmem:[#allocation7 + $0x48] sm:$0xff] }
 0x17d   : > { %v349_v10 = vpop.permute.xlu1 %348  ;;  %v493_v42 = vrot.slane %v458_v7, %v384_v25  ;;  %v612_v7 = vld [vmem:[#allocation7 + $0xf0] sm:$0xff] }
 0x17e   : > { %v378_v31 = vrot.slane %v349_v10, %v377_v23  ;;  %v674_v10 = vld [vmem:[#allocation7 + $0x2e0] sm:$0xff]  ;;  %711 = vmatpush1.msra.mxu0 %v612_v7  ;;  %v584_v7 = vld [vmem:[#allocation7 + $0x10] sm:$0xff] }
 0x17f   : > { %v494_v56 = vsel %vm386_vm1, %v493_v42, %v489_v52  ;;  %712 = vmatprep.subr.mxu0 %v611_v11  ;;  %784 = vmatpush1.msra.mxu1 %v674_v10  ;;  %v659_v42 = vld [vmem:[#allocation7 + $0x268] sm:$0xff]  ;;  %v654_v52 = vld [vmem:[#allocation7 + $0x240] sm:$0xff] }
 0x180   : > { %v346_v12 = vpop.permute.xlu0 %345  ;;  %v647_v10 = vld [vmem:[#allocation7 + $0x208] sm:$0xff] }
 0x181   : > { %v358_v13 = vpop.permute.xlu1 %357  ;;  %v373_v27 = vrot.slane %v346_v12, %v372_v22  ;;  %v673_v12 = vld [vmem:[#allocation7 + $0x2d8] sm:$0xff]  ;;  %v583_v11 = vld [vmem:[#allocation7 + $0x8] sm:$0xff] }
 0x182   : > { %v398_v32 = vrot.slane %v358_v13, %v372_v22  ;;  %v610_v13 = vld [vmem:[#allocation7 + $0xe0] sm:$0xff]  ;;  %785 = vmatprep.subr.mxu1 %v673_v12 }
 0x183   : > { %v380_v17 = vsel %vm379_vm0, %v378_v31, %v373_v27  ;;  %713 = vmatpush1.msra.mxu0 %v610_v13  ;;  %v670_v22 = vld [vmem:[#allocation7 + $0x2c0] sm:$0xff]  ;;  %786 = vmatpush1.msra.mxu1 %v672_v14  ;;  %v604_v27 = vld [vmem:[#allocation7 + $0xb0] sm:$0xff]  ;;  %v665_v31 = vld [vmem:[#allocation7 + $0x298] sm:$0xff] }
 0x184   : > { %v361_v20 = vpop.permute.xlu0 %360  ;;  %714 = vmatprep.subr.mxu0 %v609_v15  ;;  %787 = vmatprep.subr.mxu1 %v671_v19  ;;  %v646_v12 = vld [vmem:[#allocation7 + $0x200] sm:$0xff]  ;;  %v709_v14 = vld [vmem:[#allocation7 + $0x3f8] sm:$0xff]  ;;  %v708_v19 = vld [vmem:[#allocation7 + $0x3f0] sm:$0xff] }
 0x185   : > { %v352_v21 = vpop.permute.xlu1 %351  ;;  %v402_v28 = vrot.slane %v361_v20, %v377_v23  ;;  %v608_v20 = vld [vmem:[#allocation7 + $0xd0] sm:$0xff]  ;;  %v606_v23 = vld [vmem:[#allocation7 + $0xc0] sm:$0xff]  ;;  %788 = vmatpush1.msra.mxu1 %v670_v22  ;;  %v645_v15 = vld [vmem:[#allocation7 + $0x1f8] sm:$0xff] }
 0x186   : > { %v385_v16 = vrot.slane %v352_v21, %v384_v25  ;;  %v607_v21 = vld [vmem:[#allocation7 + $0xc8] sm:$0xff]  ;;  %715 = vmatpush1.msra.mxu0 %v608_v20  ;;  %v582_v13 = vld [vmem:[#allocation7] sm:$0xff]  ;;  %v644_v20 = vld [vmem:[#allocation7 + $0x1f0] sm:$0xff] }
 0x187   : > { %v403_v38 = vsel %vm379_vm0, %v402_v28, %v398_v32  ;;  %716 = vmatprep.subr.mxu0 %v607_v21  ;;  %v667_v28 = vld [vmem:[#allocation7 + $0x2a8] sm:$0xff]  ;;  %v601_v32 = vld [vmem:[#allocation7 + $0x98] sm:$0xff] }
 0x188   : > { %v364_v26 = vpop.permute.xlu0 %363  ;;  %v387_v43 = vsel %vm386_vm1, %v385_v16, %v380_v17  ;;  %717 = vmatpush1.msra.mxu0 %v606_v23  ;;  %v666_v16 = vld [vmem:[#allocation7 + $0x2a0] sm:$0xff]  ;;  %v707_v21 = vld [vmem:[#allocation7 + $0x3e8] sm:$0xff] }
 0x189   : > { %v355_v29 = vpop.permute.xlu1 %354  ;;  %v407_v30 = vrot.slane %v364_v26, %v384_v25  ;;  %v605_v25 = vld [vmem:[#allocation7 + $0xb8] sm:$0xff]  ;;  %v668_v26 = vld [vmem:[#allocation7 + $0x2b0] sm:$0xff]  ;;  %v598_v17 = vld [vmem:[#allocation7 + $0x80] sm:$0xff] }
 0x18a   : > { %v392_v33 = vrot.slane %v355_v29, %v391_v24  ;;  %v603_v29 = vld [vmem:[#allocation7 + $0xa8] sm:$0xff]  ;;  %718 = vmatprep.subr.mxu0 %v605_v25  ;;  %v706_v23 = vld [vmem:[#allocation7 + $0x3e0] sm:$0xff]  ;;  %v705_v25 = vld [vmem:[#allocation7 + $0x3d8] sm:$0xff] }
 0x18b   : > { %v408_v44 = vsel %vm386_vm1, %v407_v30, %v403_v38  ;;  %v602_v30 = vld [vmem:[#allocation7 + $0xa0] sm:$0xff]  ;;  %719 = vmatpush1.msra.mxu0 %v604_v27  ;;  %v661_v38 = vld [vmem:[#allocation7 + $0x278] sm:$0xff]  ;;  %v643_v22 = vld [vmem:[#allocation7 + $0x1e8] sm:$0xff] }
 0x18c   : > { %v367_v36 = vpop.permute.xlu0 %366  ;;  %v394_v47 = vsel %vm393_vm2, %v392_v33, %v387_v43  ;;  %720 = vmatprep.subr.mxu0 %v603_v29  ;;  %v664_v33 = vld [vmem:[#allocation7 + $0x290] sm:$0xff]  ;;  %v595_v43 = vld [vmem:[#allocation7 + $0x68] sm:$0xff] }
 0x18d   : > { %v449_v39 = vpop.permute.xlu1 %448  ;;  %v412_v40 = vrot.slane %v367_v36, %v391_v24  ;;  %721 = vmatpush1.msra.mxu0 %v602_v30  ;;  %v599_v36 = vld [vmem:[#allocation7 + $0x88] sm:$0xff]  ;;  %v704_v27 = vld [vmem:[#allocation7 + $0x3d0] sm:$0xff]  ;;  %v702_v30 = vld [vmem:[#allocation7 + $0x3c0] sm:$0xff] }
 0x18e   : > { %v479_v46 = vrot.slane %v449_v39, %v391_v24  ;;  %722 = vmatprep.subr.mxu0 %v601_v32  ;;  %v597_v39 = vld [vmem:[#allocation7 + $0x78] sm:$0xff]  ;;  %v703_v29 = vld [vmem:[#allocation7 + $0x3c8] sm:$0xff] }
 0x18f   : > { %v413_v48 = vsel %vm393_vm2, %v412_v40, %v408_v44  ;;  %723 = vmatpush1.msra.mxu0 %v600_v34  ;;  %v660_v40 = vld [vmem:[#allocation7 + $0x270] sm:$0xff]  ;;  %v658_v44 = vld [vmem:[#allocation7 + $0x260] sm:$0xff] }
 0x190   : > { %v461_v49 = vpop.permute.xlu0 %460  ;;  %v415_v50 = vsel %vm414_vm3, %v413_v48, %v394_v47  ;;  %v480_v57 = vsel %vm393_vm2, %v479_v46, %v475_v55  ;;  %724 = vmatprep.subr.mxu0 %v599_v36  ;;  %v657_v46 = vld [vmem:[#allocation7 + $0x258] sm:$0xff]  ;;  %v656_v48 = vld [vmem:[#allocation7 + $0x250] sm:$0xff] }
 0x191   : > { %v498_v53 = vrot.slane %v461_v49, %v391_v24  ;;  %v418_v54 = vsel %vm417_vm4, %v415_v50, 0.0  ;;  %v669_v24 = vld [vmem:[#allocation7 + $0x2b8] sm:$0xff]  ;;  %725 = vmatpush1.msra.mxu0 %v598_v17  ;;  %v592_v49 = vld [vmem:[#allocation7 + $0x50] sm:$0xff]  ;;  %v655_v50 = vld [vmem:[#allocation7 + $0x248] sm:$0xff] }
 0x192   : > { %419 = vadd.xlane.f32.xlu1 %v418_v54  ;;  %789 = vmatprep.subr.mxu1 %v669_v24  ;;  %v593_v47 = vld [vmem:[#allocation7 + $0x58] sm:$0xff]  ;;  %v642_v24 = vld [vmem:[#allocation7 + $0x1e0] sm:$0xff] }
 0x193   : > { %v499_v58 = vsel %vm393_vm2, %v498_v53, %v494_v56  ;;  %790 = vmatpush1.msra.mxu1 %v668_v26  ;;  %726 = vmatprep.subr.mxu0 %v597_v39  ;;  %v590_v53 = vld [vmem:[#allocation7 + $0x40] sm:$0xff]  ;;  %v653_v54 = vld [vmem:[#allocation7 + $0x238] sm:$0xff]  ;;  %v652_v56 = vld [vmem:[#allocation7 + $0x230] sm:$0xff] }
 0x194   : > { %v500_v59 = vsel %vm414_vm3, %v499_v58, %v480_v57  ;;  %791 = vmatprep.subr.mxu1 %v667_v28  ;;  %727 = vmatpush1.msra.mxu0 %v596_v41  ;;  %v589_v55 = vld [vmem:[#allocation7 + $0x38] sm:$0xff]  ;;  %v588_v57 = vld [vmem:[#allocation7 + $0x30] sm:$0xff]  ;;  %v651_v58 = vld [vmem:[#allocation7 + $0x228] sm:$0xff] }
 0x195   : > { %v502_v60 = vsel %vm417_vm4, %v500_v59, 0.0  ;;  %792 = vmatpush1.msra.mxu1 %v666_v16  ;;  %728 = vmatprep.subr.mxu0 %v595_v43  ;;  %v587_v59 = vld [vmem:[#allocation7 + $0x28] sm:$0xff]  ;;  %v641_v26 = vld [vmem:[#allocation7 + $0x1d8] sm:$0xff]  ;;  %v640_v28 = vld [vmem:[#allocation7 + $0x1d0] sm:$0xff] }
 0x196   : > { %503 = vadd.xlane.f32.xlu0 %v502_v60  ;;  %793 = vmatprep.subr.mxu1 %v665_v31  ;;  %v650_v60 = vld [vmem:[#allocation7 + $0x220] sm:$0xff]  ;;  %v639_v16 = vld [vmem:[#allocation7 + $0x1c8] sm:$0xff]  ;;  %v701_v31 = vld [vmem:[#allocation7 + $0x3b8] sm:$0xff] }
 0x197   : > { %794 = vmatpush1.msra.mxu1 %v664_v33  ;;  %729 = vmatpush1.msra.mxu0 %v594_v45  ;;  %v280_v36 = vld [vmem:[%s1606_s2] sm:$0x3] }
 0x198   : > { %795 = vmatprep.subr.mxu1 %v663_v35  ;;  %730 = vmatprep.subr.mxu0 %v593_v47 }
 0x199   : > { %796 = vmatpush1.msra.mxu1 %v662_v37  ;;  %731 = vmatpush1.msra.mxu0 %v592_v49  ;;  %v700_v49 = vld [vmem:[#allocation7 + $0x3b0] sm:$0xff] }
 0x19a   : > { %797 = vmatprep.subr.mxu1 %v661_v38  ;;  %732 = vmatprep.subr.mxu0 %v591_v51  ;;  %v699_v51 = vld [vmem:[#allocation7 + $0x3a8] sm:$0xff] }
 0x19b   : > { %798 = vmatpush1.msra.mxu1 %v660_v40  ;;  %733 = vmatpush1.msra.mxu0 %v590_v53  ;;  %v698_v53 = vld [vmem:[#allocation7 + $0x3a0] sm:$0xff] }
 0x19c   : > { %799 = vmatprep.subr.mxu1 %v659_v42  ;;  %734 = vmatprep.subr.mxu0 %v589_v55  ;;  %v697_v55 = vld [vmem:[#allocation7 + $0x398] sm:$0xff] }
 0x19d   : > { %800 = vmatpush1.msra.mxu1 %v658_v44  ;;  %735 = vmatpush1.msra.mxu0 %v588_v57  ;;  %v696_v57 = vld [vmem:[#allocation7 + $0x390] sm:$0xff] }
 0x19e   : > { %801 = vmatprep.subr.mxu1 %v657_v46  ;;  %736 = vmatprep.subr.mxu0 %v587_v59  ;;  %v695_v59 = vld [vmem:[#allocation7 + $0x388] sm:$0xff] }
 0x19f   : > { %802 = vmatpush1.msra.mxu1 %v656_v48  ;;  %737 = vmatpush1.msra.mxu0 %v586_v61  ;;  %v638_v48 = vld [vmem:[#allocation7 + $0x1c0] sm:$0xff] }
 0x1a0   : > { %803 = vmatprep.subr.mxu1 %v655_v50  ;;  %738 = vmatprep.subr.mxu0 %v585_v63  ;;  %v637_v50 = vld [vmem:[#allocation7 + $0x1b8] sm:$0xff]  ;;  %v694_v61 = vld [vmem:[#allocation7 + $0x380] sm:$0xff] }
 0x1a1   : > { %804 = vmatpush1.msra.mxu1 %v654_v52  ;;  %739 = vmatpush1.msra.mxu0 %v584_v7  ;;  %v636_v52 = vld [vmem:[#allocation7 + $0x1b0] sm:$0xff]  ;;  %v693_v63 = vld [vmem:[#allocation7 + $0x378] sm:$0xff] }
 0x1a2   : > { %805 = vmatprep.subr.mxu1 %v653_v54  ;;  %740 = vmatprep.subr.mxu0 %v583_v11  ;;  %v635_v54 = vld [vmem:[#allocation7 + $0x1a8] sm:$0xff]  ;;  %v692_v7 = vld [vmem:[#allocation7 + $0x370] sm:$0xff] }
 0x1a3   : > { %806 = vmatpush1.msra.mxu1 %v652_v56  ;;  %741 = vmatpush1.msra.mxu0 %v582_v13  ;;  %v634_v56 = vld [vmem:[#allocation7 + $0x1a0] sm:$0xff]  ;;  %v691_v11 = vld [vmem:[#allocation7 + $0x368] sm:$0xff] }
 0x1a4   : > { %807 = vmatprep.subr.mxu1 %v651_v58  ;;  %742 = vmatprep.subr.mxu0 %v645_v15  ;;  %v633_v58 = vld [vmem:[#allocation7 + $0x198] sm:$0xff]  ;;  %v690_v13 = vld [vmem:[#allocation7 + $0x360] sm:$0xff] }
 0x1a5   : > { %808 = vmatpush1.msra.mxu1 %v650_v60  ;;  %743 = vmatpush2.msra.mxu0 %v644_v20  ;;  %v632_v60 = vld [vmem:[#allocation7 + $0x190] sm:$0xff]  ;;  %v689_v15 = vld [vmem:[#allocation7 + $0x358] sm:$0xff]  ;;  %v626_v20 = vld [vmem:[#allocation7 + $0x160] sm:$0xff] }
 0x1a6   : > { %809 = vmatprep.subr.mxu1 %v649_v62  ;;  %744 = vmatprep.subr.mxu0 %v643_v22  ;;  %v631_v62 = vld [vmem:[#allocation7 + $0x188] sm:$0xff]  ;;  %v625_v22 = vld [vmem:[#allocation7 + $0x158] sm:$0xff] }
 0x1a7   : > { %810 = vmatpush1.msra.mxu1 %v648_v3  ;;  %745 = vmatpush2.msra.mxu0 %v642_v24  ;;  %v630_v3 = vld [vmem:[#allocation7 + $0x180] sm:$0xff]  ;;  %v624_v24 = vld [vmem:[#allocation7 + $0x150] sm:$0xff] }
 0x1a8   : > { %811 = vmatprep.subr.mxu1 %v647_v10  ;;  %746 = vmatprep.subr.mxu0 %v641_v26  ;;  %v629_v10 = vld [vmem:[#allocation7 + $0x178] sm:$0xff]  ;;  %v623_v26 = vld [vmem:[#allocation7 + $0x148] sm:$0xff] }
 0x1a9   : > { %812 = vmatpush1.msra.mxu1 %v646_v12  ;;  %747 = vmatpush2.msra.mxu0 %v640_v28  ;;  %v628_v12 = vld [vmem:[#allocation7 + $0x170] sm:$0xff]  ;;  %v622_v28 = vld [vmem:[#allocation7 + $0x140] sm:$0xff] }
 0x1aa   : > { %813 = vmatprep.subr.mxu1 %v709_v14  ;;  %748 = vmatprep.subr.mxu0 %v639_v16  ;;  %v627_v14 = vld [vmem:[#allocation7 + $0x168] sm:$0xff]  ;;  %v621_v16 = vld [vmem:[#allocation7 + $0x138] sm:$0xff] }
 0x1ab   : > { %814 = vmatpush2.msra.mxu1 %v708_v19  ;;  %749 = vmatpush2.msra.mxu0 %v638_v48 }
 0x1ac   : > { %815 = vmatprep.subr.mxu1 %v707_v21  ;;  %750 = vmatprep.subr.mxu0 %v637_v50  ;;  %v688_v21 = vld [vmem:[#allocation7 + $0x350] sm:$0xff] }
 0x1ad   : > { %816 = vmatpush2.msra.mxu1 %v706_v23  ;;  %751 = vmatpush2.msra.mxu0 %v636_v52  ;;  %v687_v23 = vld [vmem:[#allocation7 + $0x348] sm:$0xff] }
 0x1ae   : > { %817 = vmatprep.subr.mxu1 %v705_v25  ;;  %752 = vmatprep.subr.mxu0 %v635_v54  ;;  %v686_v25 = vld [vmem:[#allocation7 + $0x340] sm:$0xff] }
 0x1af   : > { %818 = vmatpush2.msra.mxu1 %v704_v27  ;;  %753 = vmatpush2.msra.mxu0 %v634_v56  ;;  %v685_v27 = vld [vmem:[#allocation7 + $0x338] sm:$0xff] }
 0x1b0   : > { %819 = vmatprep.subr.mxu1 %v703_v29  ;;  %754 = vmatprep.subr.mxu0 %v633_v58  ;;  %v684_v29 = vld [vmem:[#allocation7 + $0x330] sm:$0xff] }
 0x1b1   : > { %820 = vmatpush2.msra.mxu1 %v702_v30  ;;  %755 = vmatpush2.msra.mxu0 %v632_v60  ;;  %v683_v30 = vld [vmem:[#allocation7 + $0x328] sm:$0xff] }
 0x1b2   : > { %821 = vmatprep.subr.mxu1 %v701_v31  ;;  %756 = vmatprep.subr.mxu0 %v631_v62  ;;  %v620_v31 = vld [vmem:[#allocation7 + $0x130] sm:$0xff] }
 0x1b3   : > { %822 = vmatpush2.msra.mxu1 %v700_v49  ;;  %757 = vmatpush2.msra.mxu0 %v630_v3 }
 0x1b4   : > { %823 = vmatprep.subr.mxu1 %v699_v51  ;;  %758 = vmatprep.subr.mxu0 %v629_v10 }
 0x1b5   : > { %824 = vmatpush2.msra.mxu1 %v698_v53  ;;  %759 = vmatpush2.msra.mxu0 %v628_v12 }
 0x1b6   : > { %825 = vmatprep.subr.mxu1 %v697_v55  ;;  %760 = vmatprep.subr.mxu0 %v627_v14 }
 0x1b7   : > { %826 = vmatpush2.msra.mxu1 %v696_v57  ;;  %761 = vmatpush2.msra.mxu0 %v626_v20 }
 0x1b8   : > { %827 = vmatprep.subr.mxu1 %v695_v59  ;;  %762 = vmatprep.subr.mxu0 %v625_v22 }
 0x1b9   : > { %828 = vmatpush2.msra.mxu1 %v694_v61  ;;  %763 = vmatpush2.msra.mxu0 %v624_v24 }
 0x1ba   : > { %829 = vmatprep.subr.mxu1 %v693_v63  ;;  %764 = vmatprep.subr.mxu0 %v623_v26 }
 0x1bb   : > { %830 = vmatpush2.msra.mxu1 %v692_v7  ;;  %765 = vmatpush2.msra.mxu0 %v622_v28 }
 0x1bc   : > { %831 = vmatprep.subr.mxu1 %v691_v11  ;;  %766 = vmatprep.subr.mxu0 %v621_v16 }
 0x1bd   : > { %832 = vmatpush2.msra.mxu1 %v690_v13  ;;  %767 = vmatpush2.msra.mxu0 %v620_v31 }
 0x1be   : > { %833 = vmatprep.subr.mxu1 %v689_v15 }
 0x1bf   : > { %834 = vmatpush2.msra.mxu1 %v688_v21 }
 0x1c0   : > { %835 = vmatprep.subr.mxu1 %v687_v23 }
 0x1c1   : > { %836 = vmatpush2.msra.mxu1 %v686_v25 }
 0x1c2   : > { %837 = vmatprep.subr.mxu1 %v685_v27 }
 0x1c3   : > { %838 = vmatpush2.msra.mxu1 %v684_v29 }
 0x1c4   : > { %839 = vmatprep.subr.mxu1 %v683_v30 }
 0x21b   : > { %v420_v32 = vpop.xlane.xlu1 %419 }
 0x21c   : > { %v421_v34 = vmax.f32 %v420_v32, 0.0  ;;  %v682_v32 = vld [vmem:[#allocation7 + $0x320] sm:$0xff] }
 0x21d   : > { %840 = vmatpush2.msra.mxu1 %v682_v32 }
 0x21f   : > { %v504_v33 = vpop.xlane.xlu0 %503 }
 0x220   : > { %v505_v35 = vmax.f32 %v504_v33, 0.0  ;;  %v619_v33 = vld [vmem:[#allocation7 + $0x128] sm:$0xff] }
 0x221   : > { %768 = vmatprep.subr.mxu0 %v619_v33 }
 0x222   : > { %v506_v37 = vadd.f32 %v505_v35, %v421_v34  ;;  %v681_v34 = vld [vmem:[#allocation7 + $0x318] sm:$0xff]  ;;  %v618_v35 = vld [vmem:[#allocation7 + $0x120] sm:$0xff] }
 0x223   : > { %841 = vmatprep.subr.mxu1 %v681_v34  ;;  %769 = vmatpush2.msra.mxu0 %v618_v35 }
 0x224   : > { %v507_v17 = vmul.f32 %v506_v37, %v280_v36  ;;  %v680_v36 = vld [vmem:[#allocation7 + $0x310] sm:$0xff]  ;;  %v617_v37 = vld [vmem:[#allocation7 + $0x118] sm:$0xff] }
 0x225   : > { %842 = vmatpush2.msra.mxu1 %v680_v36  ;;  %770 = vmatprep.subr.mxu0 %v617_v37 }
 0x226   : > { %v508_v38 = vsel %vm417_vm4, %v507_v17, 0.0  ;;  %v679_v17 = vld [vmem:[#allocation7 + $0x308] sm:$0xff] }
 0x227   : > { %v509_v39 = vrot.slane %v508_v38, 4  ;;  %843 = vmatprep.subr.mxu1 %v679_v17 }
 0x229   : > { %v510_v40 = vadd.f32 %v509_v39, %v508_v38  ;;  %v616_v38 = vld [vmem:[#allocation7 + $0x110] sm:$0xff]  ;;  %v678_v39 = vld [vmem:[#allocation7 + $0x300] sm:$0xff] }
 0x22a   : > { %771 = vmatpush2.msra.mxu0 %v616_v38  ;;  %844 = vmatpush2.msra.mxu1 %v678_v39 }
 0x22b   : > { %v511_v41 = vrot.slane %v510_v40, 2 }
 0x22d   : > { %v512_v42 = vadd.f32 %v511_v41, %v510_v40  ;;  %v615_v40 = vld [vmem:[#allocation7 + $0x108] sm:$0xff]  ;;  %v614_v41 = vld [vmem:[#allocation7 + $0x100] sm:$0xff] }
 0x22e   : > { %772 = vmatprep.subr.mxu0 %v615_v40 }
 0x22f   : > { %v513_v43 = vrot.slane %v512_v42, 1  ;;  %773 = vmatpush2.msra.mxu0 %v614_v41 }
 0x231   : > { %v514_v44 = vadd.f32 %v513_v43, %v512_v42 }
 0x233   : > { %v1007_v45 = vmul.f32 -1.442695, %v514_v44 }
 0x235   : > { %1091 = vpow2.f32 %v1007_v45 }
 0x242   : > { %v1092_v46 = vpop.eup %1091 }
 0x243   : > { %v518_v47 = vadd.f32 1.0, %v1092_v46 }
 0x245   : > { %1093 = vrcp.f32 %v518_v47 }
 0x252   : > { %v1094_v19 = vpop.eup %1093 }
 0x253   : > { %526 = vbcast.lane.b32.xlu1 %v1094_v19, 264  ;;  %522 = vbcast.lane.b32.xlu0 %v1094_v19, 256 }
 0x257   : > { %530 = vbcast.lane.b32.xlu1 %v1094_v19, 272  ;;  %534 = vbcast.lane.b32.xlu0 %v1094_v19, 280 }
 0x2c5   : > { %v527_v42 = vpop.permute.xlu1 %526  ;;  %v523_v43 = vpop.permute.xlu0 %522 }
 0x2c6   : > { %v1504_v44 = vmul.f32 %v527_v42, %v1454_v8  ;;  %v1507_v45 = vmul.f32 %v527_v42, %v1456_v9  ;;  %v1510_v46 = vmul.f32 %v523_v43, %v1442_v2  ;;  %v1513_v47 = vmul.f32 %v523_v43, %v1446_v4 }
 0x2c8   : > { %v544_v48 = vadd.f32 %v1504_v44, %v1510_v46  ;;  %v553_v49 = vadd.f32 %v1507_v45, %v1513_v47 }
 0x2c9   : > { %v531_v50 = vpop.permute.xlu1 %530  ;;  %v535_v51 = vpop.permute.xlu0 %534 }
 0x2ca   : > { %v1520_v8 = vmul.f32 %v531_v50, %v1438_v0  ;;  %v1523_v9 = vmul.f32 %v531_v50, %v1440_v1  ;;  %v1526_v2 = vmul.f32 %v535_v51, %v1448_v5  ;;  %v1529_v4 = vmul.f32 %v535_v51, %v1450_v6 }
 0x2cc   : > { %v545_v52 = vadd.f32 %v544_v48, %v1520_v8  ;;  %v554_v53 = vadd.f32 %v553_v49, %v1523_v9  ;;  %v564_v54 = vmax.f32 %v1510_v46, %v1520_v8  ;;  %v573_v0 = vmax.f32 %v1513_v47, %v1523_v9 }
 0x2cd   : > { %v565_v1 = vmax.f32 %v1504_v44, %v1526_v2  ;;  %v574_v5 = vmax.f32 %v1507_v45, %v1529_v4 }
 0x2ce   : > { %v546_v55 = vadd.f32 %v545_v52, %v1526_v2  ;;  %v555_v6 = vadd.f32 %v554_v53, %v1529_v4 }
 0x2cf   : > { %v566_v56 = vmax.f32 %v564_v54, %v565_v1  ;;  %v575_v57 = vmax.f32 %v573_v0, %v574_v5 }
 0x2d0   : > { %v547_v58 = vrot.slane %v546_v55, 4  ;;  %v556_v59 = vrot.slane %v555_v6, 4 }
 0x2d1   : > { %v567_v60 = vrot.slane %v566_v56, 4  ;;  %v576_v61 = vrot.slane %v575_v57, 4 }
 0x2d2   : > { %v548_v62 = vadd.f32 %v547_v58, %v546_v55  ;;  %v557_v63 = vadd.f32 %v556_v59, %v555_v6 }
 0x2d3   : > { %v577_v3 = vmax.f32 %v575_v57, %v576_v61  ;;  %v568_v7 = vmax.f32 %v566_v56, %v567_v60 }
 0x2d4   : > { %v558_v10 = vrot.slane %v557_v63, 2  ;;  %v549_v11 = vrot.slane %v548_v62, 2 }
 0x2d5   : > { %v578_v12 = vrot.slane %v577_v3, 2  ;;  %v569_v13 = vrot.slane %v568_v7, 2 }
 0x2d6   : > { %v559_v14 = vadd.f32 %v558_v10, %v557_v63  ;;  %v550_v15 = vadd.f32 %v549_v11, %v548_v62 }
 0x2d7   : > { %v579_v19 = vmax.f32 %v577_v3, %v578_v12  ;;  %v570_v20 = vmax.f32 %v568_v7, %v569_v13 }
 0x2d8   : > { %v560_v21 = vrot.slane %v559_v14, 1  ;;  %v551_v22 = vrot.slane %v550_v15, 1 }
 0x2d9   : > { %v580_v23 = vrot.slane %v579_v19, 1  ;;  %v571_v24 = vrot.slane %v570_v20, 1 }
 0x2da   : > { %v561_v25 = vadd.f32 %v560_v21, %v559_v14  ;;  %v552_v26 = vadd.f32 %v551_v22, %v550_v15 }
 0x2db   : > { %v581_v27 = vmax.f32 %v579_v19, %v580_v23  ;;  %v572_v28 = vmax.f32 %v570_v20, %v571_v24 }
 0x2dc   : > { %v563_v29 = vmul.f32 0.03125, %v561_v25  ;;  %v562_v16 = vmul.f32 0.03125, %v552_v26 }
 0x2dd   : > { %845 = vmatprep.mubr.f32.mxu1 %v581_v27 }
 0x2de   : > { %846 = vmatmul.mubr.f32.vlgmr.msra.gmra.mxu1 %v572_v28  ;;  %774 = vmatprep.mubr.f32.mxu0 %v563_v29 }
 0x2df   : > { %775 = vmatmul.mubr.f32.vlgmr.msra.gmra.mxu0 %v562_v16 }
 0x39e   : > { %v847_v30 = vpop.f32.mrf.mxu1 }
 0x39f   : > { %v776_v31 = vpop.f32.mrf.mxu0 }
 0x3a0   : > { %v848_v32 = vadd.f32 %v847_v30, %v776_v31  ;;  %v849_v33 = vpop.f32.mrf.mxu1 }
 0x3a1   : > { %v778_v34 = vpop.f32.mrf.mxu0 }
 0x3a2   : > { %v1008_v35 = vmul.f32 -1.442695, %v848_v32  ;;  %v850_v36 = vadd.f32 %v849_v33, %v778_v34 }
 0x3a4   : > { %1095 = vpow2.f32 %v1008_v35  ;;  %v1009_v37 = vmul.f32 -1.442695, %v850_v36 }
 0x3a6   : > { %1097 = vpow2.f32 %v1009_v37 }
 0x3b1   : > { %v1096_v17 = vpop.eup %1095 }
 0x3b2   : > { %v858_v38 = vadd.f32 1.0, %v1096_v17 }
 0x3b3   : > { %v1098_v39 = vpop.eup %1097 }
 0x3b4   : > { %1099 = vrcp.f32 %v858_v38  ;;  %v859_v40 = vadd.f32 1.0, %v1098_v39 }
 0x3b6   : > { %1101 = vrcp.f32 %v859_v40 }
 0x3c1   : > { %v1100_v41 = vpop.eup %1099 }
 0x3c2   : > { %v867_v42 = vrot.slane %v1100_v41, %v1474_v18 }
 0x3c3   : > { %v1102_v43 = vpop.eup %1101 }
 0x3c4   : > { %v872_v48 = vmul.f32 %v867_v42, %v1510_v46  ;;  %v874_v49 = vmul.f32 %v867_v42, %v1504_v44  ;;  %v876_v50 = vmul.f32 %v867_v42, %v1520_v8  ;;  %v878_v51 = vmul.f32 %v867_v42, %v1526_v2 }
 0x3c5   : > { %v871_v52 = vrot.slane %v1102_v43, %v1474_v18 }
 0x3c6   : > { %880 = vst [vmem:[%s242_s22] sm:$0xff] %v872_v48  ;;  %882 = vst [vmem:[%s242_s22 + $0x10] sm:$0xff] %v874_v49 }
 0x3c7   : > { %884 = vst [vmem:[%s242_s22 + $0x20] sm:$0xff] %v876_v50  ;;  %886 = vst [vmem:[%s242_s22 + $0x30] sm:$0xff] %v878_v51  ;;  %v873_v44 = vmul.f32 %v871_v52, %v1513_v47  ;;  %v875_v46 = vmul.f32 %v871_v52, %v1507_v45  ;;  %v877_v18 = vmul.f32 %v871_v52, %v1523_v9 }
 0x3c8   : > { %v879_v8 = vmul.f32 %v871_v52, %v1529_v4 }
 0x3c9   : > { %881 = vst [vmem:[%s242_s22 + $0x8] sm:$0xff] %v873_v44  ;;  %883 = vst [vmem:[%s242_s22 + $0x18] sm:$0xff] %v875_v46 }
 0x3ca   : > { %885 = vst [vmem:[%s242_s22 + $0x28] sm:$0xff] %v877_v18  ;;  %887 = vst [vmem:[%s242_s22 + $0x38] sm:$0xff] %v879_v8 }
 0x3cb   : > { %1196 = shalt.err (!%p1193_p12)
}
 0x3cc   : > { %s1197_s10 = scalar_lea.hbm %s1555_s6, 1024  ;;  %s1201_s23 = scalar_lea.hbm %s1608_s4, 2048 }
 0x3cd   : > { %p1198_p6 = scmp.ne.s32.totalorder %s1555_s6, %s1197_s10  ;;  %p1202_p13 = scmp.lt.s32.totalorder %s1555_s6, %s1608_s4 }
 0x3ce   : > { %p1203_p3 = scmp.lt.s32.totalorder %s1201_s23, %s1197_s10 }
 0x3cf   : > { %p1199_p7 = pnand %p1198_p6, %p1627_p0 }
 0x3d0   : > { %p1204_p8 = por %p1203_p3, %p1202_p13 }
 0x3d1   : > { %p1200_p11 = pneg %p1199_p7 }
 0x3d3   : > { %p1205_p2 = pnand %p1204_p8, %p1200_p11 }
 0x3d5   : > { %1208 = shalt.err (!%p1205_p2)
}
 0x3d6   : > { %s1260_s29 = smov 256   ;;  %s1261_s20 = smov 16  }
 0x3d7   : > { %1027 = dma.vmem_to_hbm [thread:$0]  (%p1627_p0), %s1557_s11, 1024, %s1555_s6, %s889_s25, %s1260_s29, %s1260_s29, %s1261_s20  }
 0x3d8 PF: > { %s917_s22 = sand.u32 1, %s1239_s15   ;;  %p1628_p4 = scmp.ne.s32.totalorder %s1617_s28, 0 }
 0x3d9   : > { %p1629_p5 = scmp.ge.s32.totalorder %s1251_s18, 2  ;;  %s918_s19 = scalar_lea.sflag [#allocation4], %s917_s22 }
 0x3db   : > { %p1041_p9 = pnand %p1629_p5, %p1628_p4 }
 0x3dd   : > { %p1042_p10 = pneg %p1041_p9 }
 0x3df   : > { %1234 = dma.done.wait (%p1042_p10), %s918_s19, 1024  }
 0x3e0   : > { %1236 = vsyncadd (%p1042_p10), %s918_s19, 4294966272  ;;  %p18_p1 = scmp.ge.s32.totalorder %s1312_s21, 4   ;;  %s1630_s15 = smov %s1243_s16 }
 0x3e1   : > { %s1631_s16 = smov %s1247_s17  ;;  %s1632_s17 = smov %s1324_s24 }
 0x3e2   : > { %s1633_s18 = smov %s1312_s21  ;;  %20 = sbr.rel (!%p18_p1) target bundleno = 8 (0x8), region = 89 }
 0x3e7   :  { %923 = vsyncpa [#allocation3], 1 }
 0x3e8   :  { %925 = vsyncpa [#allocation3 + $0x1], 1 }
 0x3e9   :  { %926 = vsyncpa [#allocation6], 1 }
 0x3ea   :  { %927 = vsyncpa [#allocation4], 1 }
 0x3eb   :  { %929 = vsyncpa [#allocation4 + $0x1], 1 }

// kernel: tpu_custom_call.1
= control target key start
LH: loop header
LB: loop body
LE: loop exit
PB: predicated region body
PF: predicated region fallthrough
CT: control target
= control target key end

     0   :  { %s1604_s0 = inlined_call_operand.hbm [shape: f32[2,32,256], index: 0, kind: input, shape index: {}]   ;;  %s1605_s1 = inlined_call_operand.hbm [shape: f32[2,32], index: 1, kind: input, shape index: {}]   ;;  %s1606_s2 = inlined_call_operand.vmem [shape: f32[2,32], index: 2, kind: input, shape index: {}]   ;;  %s1607_s3 = inlined_call_operand.hbm [shape: f32[512,256], index: 3, kind: input, shape index: {}]   ;;  %s1608_s4 = inlined_call_operand.hbm [shape: f32[2,32,256], index: 4, kind: output, shape index: {}]  }
   0x1   :  { %1613 = sst [smem:[#allocation12_spill]] %s1605_s1 }
   0x2   :  { %9 = vsyncpa [#allocation3], 0 }
   0x3   :  { %11 = vsyncpa [#allocation3 + $0x1], 0 }
   0x4   :  { %12 = vsyncpa [#allocation6], 0 }
   0x5   :  { %13 = vsyncpa [#allocation4], 0 }
   0x6   :  { %15 = vsyncpa [#allocation4 + $0x1], 0  ;;  %s1287_s15 = smov 0   ;;  %s1289_s16 = smov 0  }
   0x7   :  { %s1291_s17 = smov 0   ;;  %s1293_s18 = smov 0  }
   0x8 LB: > { %s1308_s19 = sadd.s32 4294967295, %s1251_s18   ;;  %s994_s20 = sadd.s32 4294967294, %s1251_s18   ;;  %s1251_s18 = sphi %s1293_s18, %s1633_s18   ;;  %s1247_s17 = sphi %s1291_s17, %s1632_s17   ;;  %s1243_s16 = sphi %s1289_s16, %s1631_s16   ;;  %s1239_s15 = sphi %s1287_s15, %s1630_s15  }
   0x9   : > { %s1312_s21 = sadd.s32 1, %s1251_s18   ;;  %s28_s22 = sadd.s32 1, %s1247_s17 }
   0xa   : > { %s25_s23 = ssub.s32 %s1251_s18, %s1312_s21  ;;  %p35_p0 = scmp.ne.s32.totalorder %s1247_s17, %s1243_s16 }
   0xb   : > { %p26_p1 = scmp.eq.s32.totalorder %s25_s23, 0  ;;  %p36_p2 = scmp.eq.s32.totalorder %s1251_s18, 0 }
   0xc   : > { %p41_p3 = scmp.ne.s32.totalorder %s1243_s16, %s1239_s15  ;;  %p1609_p4 = scmp.eq.s32.totalorder %s1308_s19, 0 }
   0xd   : > { %s1324_s24 = scalar_select %p26_p1, %s1247_s17, %s28_s22  }
   0xe   : > { %p1326_p5 = por %p36_p2, %p35_p0  ;;  %p1332_p6 = por %p1609_p4, %p41_p3 }
   0xf   : > { %p128_p7 = scmp.eq.s32.totalorder %s1308_s19, 1  ;;  %p134_p8 = scmp.eq.s32.totalorder %s994_s20, 1 }
  0x10   : > { %s1615_s26 = scalar_select %p1332_p6, 1, 0 }
  0x11   : > { %p995_p9 = scmp.ge.s32.totalorder %s1251_s18, 1  ;;  %p141_p10 = scmp.lt.s32.totalorder %s1251_s18, 3 }
  0x12   : > { %p1339_p11 = por %p128_p7, %p35_p0  ;;  %p1343_p12 = por %p134_p8, %p41_p3 }
  0x13   : > { %p1347_p13 = pnand %p995_p9, %p141_p10  ;;  %s1253_s30 = smov [#allocation5]  }
  0x14   : > { %s1616_s27 = scalar_select %p1339_p11, 1, 0 }
  0x15   : > { %s1617_s28 = scalar_select %p1343_p12, 1, 0 }
  0x16   : > { %s1618_s29 = scalar_select %p1347_p13, 1, 0 }
  0x17   : > { %p1029_p2 = pneg %p1347_p13  ;;  %s154_s5 = sshll.u32 %s1253_s30, 4  ;;  %s155_s5 = int_to_ptr.vmem [resolvable:$true] %s154_s5 }
  0x18   : > { %p1046_p4 = scmp.lt.s32.totalorder %s1251_s18, 2  ;;  %p1619_p0 = scmp.eq.s32.totalorder %s1308_s19, 0 }
  0x19   : > { %s1254_s8 = smov [#allocation7]   ;;  %s1114_s10 = scalar_lea.vmem %s155_s5, 32 }
  0x1a   : > { %p1357_p7 = pnand %p1029_p2, %p1619_p0  ;;  %p1363_p3 = pnand %p1046_p4, %p1326_p5 }
  0x1b   : > { %s167_s9 = sshll.u32 %s1254_s8, 4  ;;  %p1115_p9 = scmp.ne.s32.totalorder %s155_s5, %s1114_s10  ;;  %s168_s9 = int_to_ptr.vmem [resolvable:$true] %s167_s9 }
  0x1c   : > { %p1105_p8 = pneg %p1357_p7  ;;  %p1122_p0 = scmp.lt.s32.totalorder %s155_s5, %s155_s5 }
  0x1d   : > { %p1123_p1 = scmp.lt.s32.totalorder %s1114_s10, %s1114_s10 }
  0x1e   : > { %p1117_p10 = pnand %p1115_p9, %p1105_p8 }
  0x1f   : > { %p1124_p12 = por %p1123_p1, %p1122_p0 }
  0x20   : > { %p1118_p2 = pneg %p1117_p10 }
  0x22   : > { %p1125_p11 = pnand %p1124_p12, %p1118_p2 }
  0x24   : > { %1128 = shalt.err (!%p1125_p11)
}
  0x25   : > { %s1622_s1 = sld [smem:[#allocation12_spill]]  ;;  %s181_s13 = sand.u32 1, %s1247_s17  }
  0x26   : > { %s1140_s14 = scalar_lea.vmem %s168_s9, 16384  ;;  %p1148_p10 = scmp.lt.s32.totalorder %s168_s9, %s168_s9 }
  0x27   : > { %p1141_p4 = scmp.ne.s32.totalorder %s168_s9, %s1140_s14  ;;  %p1149_p6 = scmp.lt.s32.totalorder %s1140_s14, %s1140_s14 }
  0x29   : > { %p1143_p5 = pnand %p1141_p4, %p1105_p8  ;;  %p1150_p1 = por %p1149_p6, %p1148_p10 }
  0x2b   : > { %1032 = dma.hbm_to_vmem [thread:$0]  (!%p1357_p7), %s1622_s1, 32, %s155_s5, [#allocation6]  }
  0x2c   : > { %p1144_p9 = pneg %p1143_p5 }
  0x2e   : > { %p1151_p12 = pnand %p1150_p1, %p1144_p9 }
  0x30   : > { %1154 = shalt.err (!%p1151_p12)
}
  0x31   : > { %s1255_s20 = smov 256   ;;  %s1256_s22 = smov 16  }
  0x32   : > { %1035 = dma.hbm_to_vmem [thread:$0]  (!%p1357_p7), %s1607_s3, 16384, %s168_s9, [#allocation6], %s1255_s20, %s1255_s20, %s1256_s22  }
  0x33   : > { %s999_s30 = sshll.u32 %s181_s13, 6  ;;  %s1015_s5 = sshll.u32 %s1251_s18, 10 }
  0x34   : > { %s1393_s11 = scalar_lea.hbm %s1604_s0, %s1015_s5  ;;  %s185_s12 = scalar_lea.vmem [#allocation2], %s999_s30 }
  0x35   : > { %s192_s14 = sshll.u32 %s185_s12, 4  ;;  %s1397_s6 = scalar_lea.sflag [#allocation3], %s181_s13  ;;  %s1395_s14 = int_to_ptr.vmem [resolvable:$true] %s192_s14 }
  0x36   : > { %s1155_s1 = scalar_lea.hbm %s1393_s11, 1024  ;;  %p1157_p11 = pneg %p1363_p3 }
  0x37   : > { %p1156_p6 = scmp.ne.s32.totalorder %s1393_s11, %s1155_s1  ;;  %s1160_s25 = scalar_lea.hbm %s1604_s0, 2048 }
  0x38   : > { %p1161_p2 = scmp.lt.s32.totalorder %s1393_s11, %s1604_s0  ;;  %p1162_p0 = scmp.lt.s32.totalorder %s1160_s25, %s1155_s1 }
  0x39   : > { %p1158_p7 = pnand %p1157_p11, %p1156_p6 }
  0x3a   : > { %p1163_p4 = por %p1162_p0, %p1161_p2 }
  0x3b   : > { %p1159_p8 = pneg %p1158_p7 }
  0x3d   : > { %p1164_p5 = pnand %p1163_p4, %p1159_p8 }
  0x3f   : > { %1167 = shalt.err (!%p1164_p5)
}
  0x40   : > { %s1168_s13 = scalar_lea.vmem %s1395_s14, 1024  ;;  %s1257_s30 = smov [#allocation2]  }
  0x41   : > { %p1169_p9 = scmp.ne.s32.totalorder %s1395_s14, %s1168_s13  ;;  %s1173_s10 = sshll.u32 %s1257_s30, 4  ;;  %s1174_s10 = int_to_ptr.vmem [resolvable:$false] %s1173_s10 }
  0x42   : > { %s1175_s12 = scalar_lea.vmem %s1174_s10, 2048  ;;  %p1176_p12 = scmp.lt.s32.totalorder %s1395_s14, %s1174_s10 }
  0x43   : > { %p1171_p10 = pnand %p1169_p9, %p1157_p11  ;;  %p1177_p6 = scmp.lt.s32.totalorder %s1175_s12, %s1168_s13 }
  0x45   : > { %p1172_p1 = pneg %p1171_p10  ;;  %p1178_p7 = por %p1177_p6, %p1176_p12 }
  0x47   : > { %p1179_p13 = pnand %p1178_p7, %p1172_p1 }
  0x49   : > { %1182 = shalt.err (!%p1179_p13)
}
  0x4a   : > { %1039 = dma.hbm_to_vmem [thread:$0]  (!%p1363_p3), %s1393_s11, 1024, %s1395_s14, %s1397_s6, %s1255_s20, %s1255_s20, %s1256_s22  }
  0x4b   : > { %p1623_p11 = scmp.ne.s32.totalorder %s1618_s29, 0 }
  0x4c   : > { %s1424_s1 = sand.u32 (!%p1623_p11), 1, %s1243_s16   ;;  %p1624_p13 = scmp.ne.s32.totalorder (!%p1623_p11), %s1615_s26, 0 }
  0x4d   : > { %204 = sbr.rel (%p1623_p11) target bundleno = 984 (0x3d8), region = 36  ;;  %s1003_s9 = sshll.u32 (!%p1623_p11), %s1424_s1, 6 }
  0x4e   : > { %s207_s23 = scalar_lea.sflag (!%p1623_p11), [#allocation3], %s1424_s1  ;;  %s210_s7 = scalar_lea.vmem (!%p1623_p11), [#allocation2], %s1003_s9 }
  0x52   : > { %1226 = dma.done.wait (%p1624_p13), %s207_s23, 1024  }
  0x53   : > { %1228 = vsyncadd (%p1624_p13), %s207_s23, 4294966272  ;;  %p1625_p3 = scmp.eq.s32.totalorder %s1308_s19, 0 }
  0x55   : > { %1230 = dma.done.wait (%p1625_p3), [#allocation6], 16416   ;;  %p1626_p8 = pmov %p1625_p3 }
  0x56   : > { %v1438_v0 = vld [vmem:[%s210_s7 + $0x20] sm:$0xff]  ;;  %v1440_v1 = vld [vmem:[%s210_s7 + $0x28] sm:$0xff]  ;;  %v1448_v5 = vld [vmem:[%s210_s7 + $0x30] sm:$0xff]  ;;  %v282_v16 = vlaneseq  ;;  %v1258_v22 = vmov 0   ;;  %vm379_vm0 = vcmask 130112   ;;  %vm386_vm1 = vcmask 195712  }
  0x57   : > { %1232 = vsyncadd (%p1626_p8), [#allocation6], 4294950880  ;;  %v1442_v2 = vld [vmem:[%s210_s7] sm:$0xff]  ;;  %v257_v3 = vadd.f32 %v1440_v1, %v1438_v0  ;;  %v1446_v4 = vld [vmem:[%s210_s7 + $0x8] sm:$0xff]  ;;  %v273_v15 = vmax.f32 %v1438_v0, %v1440_v1  ;;  %1090 = vset.pattern.permute.xlu0 %v1258_v22  ;;  %1089 = vset.pattern.permute.xlu1 %v1258_v22  ;;  %vm393_vm2 = vcmask 261312   ;;  %vm414_vm3 = vcmask 1041409  }
  0x58   : > { %v1450_v6 = vld [vmem:[%s210_s7 + $0x38] sm:$0xff]  ;;  %v251_v7 = vadd.f32 %v1446_v4, %v1442_v2  ;;  %v1454_v8 = vld [vmem:[%s210_s7 + $0x10] sm:$0xff]  ;;  %v267_v13 = vmax.f32 %v1442_v2, %v1446_v4  ;;  %v1471_v17 = vshrl.u32 %v282_v16, 7  ;;  %v279_v19 = vld [vmem:[#allocation5] sm:$0x3]  ;;  %vm417_vm4 = vcmask 254976  }
  0x59   : > { %v1456_v9 = vld [vmem:[%s210_s7 + $0x18] sm:$0xff]  ;;  %258 = vadd.xlane.f32.xlu1 %v257_v3  ;;  %v260_v10 = vadd.f32 %v1450_v6, %v1448_v5  ;;  %v276_v14 = vmax.f32 %v1448_v5, %v1450_v6  ;;  %s1016_s20 = sshll.u32 %s1308_s19, 10  ;;  %s242_s22 = scalar_lea.vmem [#allocation8], %s1003_s9 }
  0x5a   : > { %252 = vadd.xlane.f32.xlu0 %v251_v7  ;;  %v254_v11 = vadd.f32 %v1456_v9, %v1454_v8  ;;  %v270_v12 = vmax.f32 %v1454_v8, %v1456_v9  ;;  %v1474_v18 = vsub.s32 0, %v1471_v17  ;;  %v303_v21 = vsub.s32 1, %v1471_v17  ;;  %s902_s11 = sshll.u32 %s242_s22, 4  ;;  %s1555_s6 = scalar_lea.hbm %s1608_s4, %s1016_s20  ;;  %s1557_s11 = int_to_ptr.vmem [resolvable:$true] %s902_s11 }
  0x5b   : > { %s889_s25 = scalar_lea.sflag [#allocation4], %s1424_s1  ;;  %s1183_s5 = scalar_lea.vmem %s1557_s11, 1024 }
  0x5c   : > { %v285_v20 = vrot.slane %v279_v19, %v1474_v18  ;;  %v304_v23 = vrot.slane %v279_v19, %v303_v21  ;;  %p1184_p2 = scmp.ne.s32.totalorder %s1557_s11, %s1183_s5  ;;  %p1627_p0 = scmp.ne.s32.totalorder %s1616_s27, 0 }
  0x5d   : > { %261 = vadd.xlane.f32.xlu1 %v260_v10  ;;  %s1259_s8 = smov [#allocation8]  }
  0x5e   : > { %255 = vadd.xlane.f32.xlu0 %v254_v11  ;;  %v369_v11 = vand.u32 127, %v282_v16  ;;  %p1185_p4 = pnand %p1184_p2, %p1627_p0  ;;  %s1187_s13 = sshll.u32 %s1259_s8, 4  ;;  %s1188_s13 = int_to_ptr.vmem [resolvable:$false] %s1187_s13 }
  0x5f   : > { %s1189_s30 = scalar_lea.vmem %s1188_s13, 2048  ;;  %p1190_p9 = scmp.lt.s32.totalorder %s1557_s11, %s1188_s13 }
  0x60   : > { %v381_v19 = vadd.s32 4294967280, %v369_v11  ;;  %v372_v22 = vsub.s32 %v369_v11, %v1471_v17  ;;  %p1186_p5 = pneg %p1185_p4  ;;  %p1191_p10 = scmp.lt.s32.totalorder %s1189_s30, %s1183_s5 }
  0x61   : > { %271 = vmax.xlane.f32.xlu1 %v270_v12 }
  0x62   : > { %268 = vmax.xlane.f32.xlu0 %v267_v13  ;;  %p1192_p1 = por %p1191_p10, %p1190_p9 }
  0x64   : > { %p1193_p12 = pnand %p1192_p1, %p1186_p5 }
  0x65   : > { %277 = vmax.xlane.f32.xlu1 %v276_v14  ;;  %v374_v14 = vadd.s32 4294967288, %v369_v11 }
  0x66   : > { %274 = vmax.xlane.f32.xlu0 %v273_v15  ;;  %v388_v15 = vadd.s32 4294967272, %v369_v11  ;;  %v611_v11 = vld [vmem:[#allocation7 + $0xe8] sm:$0xff] }
  0x76   : > { %291 = vbcast.lane.b32.xlu1 %v285_v20, 264 }
  0x7a   : > { %306 = vbcast.lane.b32.xlu1 %v304_v23, 256 }
  0x7c   : > { %287 = vbcast.lane.b32.xlu0 %v285_v20, 256 }
  0x7e   : > { %310 = vbcast.lane.b32.xlu1 %v304_v23, 264 }
  0x80   : > { %295 = vbcast.lane.b32.xlu0 %v285_v20, 272 }
  0x82   : > { %314 = vbcast.lane.b32.xlu1 %v304_v23, 272 }
  0x84   : > { %299 = vbcast.lane.b32.xlu0 %v285_v20, 280 }
  0x86   : > { %318 = vbcast.lane.b32.xlu1 %v304_v23, 280  ;;  %v377_v23 = vsub.s32 %v374_v14, %v1471_v17  ;;  %v672_v14 = vld [vmem:[#allocation7 + $0x2d0] sm:$0xff] }
  0xe2   : > { %v259_v24 = vpop.xlane.xlu1 %258 }
  0xe3   : > { %v253_v25 = vpop.xlane.xlu0 %252  ;;  %v265_v49 = vmul.f32 0.00390625, %v259_v24  ;;  %v391_v24 = vsub.s32 %v388_v15, %v1471_v17  ;;  %v609_v15 = vld [vmem:[#allocation7 + $0xd8] sm:$0xff] }
  0xe4   : > { %v263_v46 = vmul.f32 0.00390625, %v253_v25  ;;  %v384_v25 = vsub.s32 %v381_v19, %v1471_v17  ;;  %v671_v19 = vld [vmem:[#allocation7 + $0x2c8] sm:$0xff] }
  0xe6   : > { %v262_v26 = vpop.xlane.xlu1 %261 }
  0xe7   : > { %v256_v27 = vpop.xlane.xlu0 %255  ;;  %v266_v53 = vmul.f32 0.00390625, %v262_v26 }
  0xe8   : > { %v264_v42 = vmul.f32 0.00390625, %v256_v27 }
  0xea   : > { %v272_v28 = vpop.xlane.xlu1 %271 }
  0xeb   : > { %v269_v29 = vpop.xlane.xlu0 %268 }
  0xee   : > { %v278_v30 = vpop.xlane.xlu1 %277 }
  0xef   : > { %v275_v31 = vpop.xlane.xlu0 %274 }
  0xf2   : > { %v292_v32 = vpop.permute.xlu1 %291 }
  0xf3   : > { %v423_v33 = vmul.f32 %v292_v32, %v272_v28  ;;  %v288_v34 = vpop.permute.xlu0 %287  ;;  %v329_v45 = vmul.f32 %v292_v32, %v264_v42 }
  0xf4   : > { %v422_v35 = vmul.f32 %v288_v34, %v269_v29  ;;  %v328_v47 = vmul.f32 %v288_v34, %v263_v46 }
  0xf5   : > { %442 = vperm.xlu0 %1090, %v423_v33  }
  0xf6   : > { %439 = vperm.xlu1 %1089, %v422_v35   ;;  %v307_v36 = vpop.permute.xlu1 %306 }
  0xf7   : > { %v426_v37 = vmul.f32 %v307_v36, %v269_v29  ;;  %v296_v38 = vpop.permute.xlu0 %295  ;;  %v332_v48 = vmul.f32 %v307_v36, %v263_v46 }
  0xf8   : > { %v424_v41 = vmul.f32 %v296_v38, %v275_v31  ;;  %v330_v51 = vmul.f32 %v296_v38, %v265_v49 }
  0xfa   : > { %451 = vperm.xlu1 %1089, %v426_v37   ;;  %v311_v39 = vpop.permute.xlu1 %310 }
  0xfb   : > { %v427_v40 = vmul.f32 %v311_v39, %v272_v28  ;;  %v333_v50 = vmul.f32 %v311_v39, %v264_v42  ;;  %v300_v52 = vpop.permute.xlu0 %299 }
  0xfc   : > { %v331_v55 = vmul.f32 %v300_v52, %v266_v53  ;;  %v425_v58 = vmul.f32 %v300_v52, %v278_v30 }
  0xfd   : > { %454 = vperm.xlu0 %1090, %v427_v40  }
  0xfe   : > { %445 = vperm.xlu1 %1089, %v424_v41   ;;  %v315_v43 = vpop.permute.xlu1 %314 }
  0xff   : > { %v428_v44 = vmul.f32 %v315_v43, %v275_v31  ;;  %v334_v54 = vmul.f32 %v315_v43, %v265_v49 }
 0x101   : > { %457 = vperm.xlu0 %1090, %v428_v44  }
 0x102   : > { %348 = vperm.xlu1 %1089, %v329_v45   ;;  %v319_v56 = vpop.permute.xlu1 %318 }
 0x103   : > { %v335_v57 = vmul.f32 %v319_v56, %v266_v53  ;;  %v429_v59 = vmul.f32 %v319_v56, %v278_v30 }
 0x105   : > { %345 = vperm.xlu0 %1090, %v328_v47  }
 0x106   : > { %357 = vperm.xlu1 %1089, %v332_v48  }
 0x109   : > { %360 = vperm.xlu0 %1090, %v333_v50  }
 0x10a   : > { %351 = vperm.xlu1 %1089, %v330_v51  }
 0x10d   : > { %363 = vperm.xlu0 %1090, %v334_v54  }
 0x10e   : > { %354 = vperm.xlu1 %1089, %v331_v55  }
 0x111   : > { %366 = vperm.xlu0 %1090, %v335_v57  }
 0x112   : > { %448 = vperm.xlu1 %1089, %v425_v58  }
 0x115   : > { %460 = vperm.xlu0 %1090, %v429_v59  }
 0x170   : > { %v443_v61 = vpop.permute.xlu0 %442 }
 0x171   : > { %v440_v60 = vpop.permute.xlu1 %439  ;;  %v469_v35 = vrot.slane %v443_v61, %v377_v23  ;;  %v677_v61 = vld [vmem:[#allocation7 + $0x2f8] sm:$0xff] }
 0x172   : > { %v465_v34 = vrot.slane %v440_v60, %v372_v22  ;;  %781 = vmatprep.subr.mxu1 %v677_v61  ;;  %v586_v61 = vld [vmem:[#allocation7 + $0x20] sm:$0xff] }
 0x174   : > { %v470_v51 = vsel %vm379_vm0, %v469_v35, %v465_v34  ;;  %v600_v34 = vld [vmem:[#allocation7 + $0x90] sm:$0xff]  ;;  %v663_v35 = vld [vmem:[#allocation7 + $0x288] sm:$0xff] }
 0x175   : > { %v452_v62 = vpop.permute.xlu1 %451 }
 0x176   : > { %v484_v45 = vrot.slane %v452_v62, %v372_v22  ;;  %v676_v62 = vld [vmem:[#allocation7 + $0x2f0] sm:$0xff] }
 0x177   : > { %782 = vmatpush1.msra.mxu1 %v676_v62  ;;  %v649_v62 = vld [vmem:[#allocation7 + $0x218] sm:$0xff] }
 0x178   : > { %v455_v63 = vpop.permute.xlu0 %454 }
 0x179   : > { %v446_v3 = vpop.permute.xlu1 %445  ;;  %v488_v37 = vrot.slane %v455_v63, %v377_v23  ;;  %v613_v63 = vld [vmem:[#allocation7 + $0xf8] sm:$0xff] }
 0x17a   : > { %v474_v41 = vrot.slane %v446_v3, %v384_v25  ;;  %710 = vmatprep.subr.mxu0 %v613_v63  ;;  %v675_v3 = vld [vmem:[#allocation7 + $0x2e8] sm:$0xff]  ;;  %v585_v63 = vld [vmem:[#allocation7 + $0x18] sm:$0xff] }
 0x17b   : > { %v489_v52 = vsel %vm379_vm0, %v488_v37, %v484_v45  ;;  %783 = vmatprep.subr.mxu1 %v675_v3  ;;  %v662_v37 = vld [vmem:[#allocation7 + $0x280] sm:$0xff]  ;;  %v648_v3 = vld [vmem:[#allocation7 + $0x210] sm:$0xff] }
 0x17c   : > { %v458_v7 = vpop.permute.xlu0 %457  ;;  %v475_v55 = vsel %vm386_vm1, %v474_v41, %v470_v51  ;;  %v596_v41 = vld [vmem:[#allocation7 + $0x70] sm:$0xff]  ;;  %v594_v45 = vld [vmem:[#allocation7 + $0x60] sm:$0xff]  ;;  %v591_v51 = vld [vmem:[#allocation7 + $0x48] sm:$0xff] }
 0x17d   : > { %v349_v10 = vpop.permute.xlu1 %348  ;;  %v493_v42 = vrot.slane %v458_v7, %v384_v25  ;;  %v612_v7 = vld [vmem:[#allocation7 + $0xf0] sm:$0xff] }
 0x17e   : > { %v378_v31 = vrot.slane %v349_v10, %v377_v23  ;;  %v674_v10 = vld [vmem:[#allocation7 + $0x2e0] sm:$0xff]  ;;  %711 = vmatpush1.msra.mxu0 %v612_v7  ;;  %v584_v7 = vld [vmem:[#allocation7 + $0x10] sm:$0xff] }
 0x17f   : > { %v494_v56 = vsel %vm386_vm1, %v493_v42, %v489_v52  ;;  %712 = vmatprep.subr.mxu0 %v611_v11  ;;  %784 = vmatpush1.msra.mxu1 %v674_v10  ;;  %v659_v42 = vld [vmem:[#allocation7 + $0x268] sm:$0xff]  ;;  %v654_v52 = vld [vmem:[#allocation7 + $0x240] sm:$0xff] }
 0x180   : > { %v346_v12 = vpop.permute.xlu0 %345  ;;  %v647_v10 = vld [vmem:[#allocation7 + $0x208] sm:$0xff] }
 0x181   : > { %v358_v13 = vpop.permute.xlu1 %357  ;;  %v373_v27 = vrot.slane %v346_v12, %v372_v22  ;;  %v673_v12 = vld [vmem:[#allocation7 + $0x2d8] sm:$0xff]  ;;  %v583_v11 = vld [vmem:[#allocation7 + $0x8] sm:$0xff] }
 0x182   : > { %v398_v32 = vrot.slane %v358_v13, %v372_v22  ;;  %v610_v13 = vld [vmem:[#allocation7 + $0xe0] sm:$0xff]  ;;  %785 = vmatprep.subr.mxu1 %v673_v12 }
 0x183   : > { %v380_v17 = vsel %vm379_vm0, %v378_v31, %v373_v27  ;;  %713 = vmatpush1.msra.mxu0 %v610_v13  ;;  %v670_v22 = vld [vmem:[#allocation7 + $0x2c0] sm:$0xff]  ;;  %786 = vmatpush1.msra.mxu1 %v672_v14  ;;  %v604_v27 = vld [vmem:[#allocation7 + $0xb0] sm:$0xff]  ;;  %v665_v31 = vld [vmem:[#allocation7 + $0x298] sm:$0xff] }
 0x184   : > { %v361_v20 = vpop.permute.xlu0 %360  ;;  %714 = vmatprep.subr.mxu0 %v609_v15  ;;  %787 = vmatprep.subr.mxu1 %v671_v19  ;;  %v646_v12 = vld [vmem:[#allocation7 + $0x200] sm:$0xff]  ;;  %v709_v14 = vld [vmem:[#allocation7 + $0x3f8] sm:$0xff]  ;;  %v708_v19 = vld [vmem:[#allocation7 + $0x3f0] sm:$0xff] }
 0x185   : > { %v352_v21 = vpop.permute.xlu1 %351  ;;  %v402_v28 = vrot.slane %v361_v20, %v377_v23  ;;  %v608_v20 = vld [vmem:[#allocation7 + $0xd0] sm:$0xff]  ;;  %v606_v23 = vld [vmem:[#allocation7 + $0xc0] sm:$0xff]  ;;  %788 = vmatpush1.msra.mxu1 %v670_v22  ;;  %v645_v15 = vld [vmem:[#allocation7 + $0x1f8] sm:$0xff] }
 0x186   : > { %v385_v16 = vrot.slane %v352_v21, %v384_v25  ;;  %v607_v21 = vld [vmem:[#allocation7 + $0xc8] sm:$0xff]  ;;  %715 = vmatpush1.msra.mxu0 %v608_v20  ;;  %v582_v13 = vld [vmem:[#allocation7] sm:$0xff]  ;;  %v644_v20 = vld [vmem:[#allocation7 + $0x1f0] sm:$0xff] }
 0x187   : > { %v403_v38 = vsel %vm379_vm0, %v402_v28, %v398_v32  ;;  %716 = vmatprep.subr.mxu0 %v607_v21  ;;  %v667_v28 = vld [vmem:[#allocation7 + $0x2a8] sm:$0xff]  ;;  %v601_v32 = vld [vmem:[#allocation7 + $0x98] sm:$0xff] }
 0x188   : > { %v364_v26 = vpop.permute.xlu0 %363  ;;  %v387_v43 = vsel %vm386_vm1, %v385_v16, %v380_v17  ;;  %717 = vmatpush1.msra.mxu0 %v606_v23  ;;  %v666_v16 = vld [vmem:[#allocation7 + $0x2a0] sm:$0xff]  ;;  %v707_v21 = vld [vmem:[#allocation7 + $0x3e8] sm:$0xff] }
 0x189   : > { %v355_v29 = vpop.permute.xlu1 %354  ;;  %v407_v30 = vrot.slane %v364_v26, %v384_v25  ;;  %v605_v25 = vld [vmem:[#allocation7 + $0xb8] sm:$0xff]  ;;  %v668_v26 = vld [vmem:[#allocation7 + $0x2b0] sm:$0xff]  ;;  %v598_v17 = vld [vmem:[#allocation7 + $0x80] sm:$0xff] }
 0x18a   : > { %v392_v33 = vrot.slane %v355_v29, %v391_v24  ;;  %v603_v29 = vld [vmem:[#allocation7 + $0xa8] sm:$0xff]  ;;  %718 = vmatprep.subr.mxu0 %v605_v25  ;;  %v706_v23 = vld [vmem:[#allocation7 + $0x3e0] sm:$0xff]  ;;  %v705_v25 = vld [vmem:[#allocation7 + $0x3d8] sm:$0xff] }
 0x18b   : > { %v408_v44 = vsel %vm386_vm1, %v407_v30, %v403_v38  ;;  %v602_v30 = vld [vmem:[#allocation7 + $0xa0] sm:$0xff]  ;;  %719 = vmatpush1.msra.mxu0 %v604_v27  ;;  %v661_v38 = vld [vmem:[#allocation7 + $0x278] sm:$0xff]  ;;  %v643_v22 = vld [vmem:[#allocation7 + $0x1e8] sm:$0xff] }
 0x18c   : > { %v367_v36 = vpop.permute.xlu0 %366  ;;  %v394_v47 = vsel %vm393_vm2, %v392_v33, %v387_v43  ;;  %720 = vmatprep.subr.mxu0 %v603_v29  ;;  %v664_v33 = vld [vmem:[#allocation7 + $0x290] sm:$0xff]  ;;  %v595_v43 = vld [vmem:[#allocation7 + $0x68] sm:$0xff] }
 0x18d   : > { %v449_v39 = vpop.permute.xlu1 %448  ;;  %v412_v40 = vrot.slane %v367_v36, %v391_v24  ;;  %721 = vmatpush1.msra.mxu0 %v602_v30  ;;  %v599_v36 = vld [vmem:[#allocation7 + $0x88] sm:$0xff]  ;;  %v704_v27 = vld [vmem:[#allocation7 + $0x3d0] sm:$0xff]  ;;  %v702_v30 = vld [vmem:[#allocation7 + $0x3c0] sm:$0xff] }
 0x18e   : > { %v479_v46 = vrot.slane %v449_v39, %v391_v24  ;;  %722 = vmatprep.subr.mxu0 %v601_v32  ;;  %v597_v39 = vld [vmem:[#allocation7 + $0x78] sm:$0xff]  ;;  %v703_v29 = vld [vmem:[#allocation7 + $0x3c8] sm:$0xff] }
 0x18f   : > { %v413_v48 = vsel %vm393_vm2, %v412_v40, %v408_v44  ;;  %723 = vmatpush1.msra.mxu0 %v600_v34  ;;  %v660_v40 = vld [vmem:[#allocation7 + $0x270] sm:$0xff]  ;;  %v658_v44 = vld [vmem:[#allocation7 + $0x260] sm:$0xff] }
 0x190   : > { %v461_v49 = vpop.permute.xlu0 %460  ;;  %v415_v50 = vsel %vm414_vm3, %v413_v48, %v394_v47  ;;  %v480_v57 = vsel %vm393_vm2, %v479_v46, %v475_v55  ;;  %724 = vmatprep.subr.mxu0 %v599_v36  ;;  %v657_v46 = vld [vmem:[#allocation7 + $0x258] sm:$0xff]  ;;  %v656_v48 = vld [vmem:[#allocation7 + $0x250] sm:$0xff] }
 0x191   : > { %v498_v53 = vrot.slane %v461_v49, %v391_v24  ;;  %v418_v54 = vsel %vm417_vm4, %v415_v50, 0.0  ;;  %v669_v24 = vld [vmem:[#allocation7 + $0x2b8] sm:$0xff]  ;;  %725 = vmatpush1.msra.mxu0 %v598_v17  ;;  %v592_v49 = vld [vmem:[#allocation7 + $0x50] sm:$0xff]  ;;  %v655_v50 = vld [vmem:[#allocation7 + $0x248] sm:$0xff] }
 0x192   : > { %419 = vadd.xlane.f32.xlu1 %v418_v54  ;;  %789 = vmatprep.subr.mxu1 %v669_v24  ;;  %v593_v47 = vld [vmem:[#allocation7 + $0x58] sm:$0xff]  ;;  %v642_v24 = vld [vmem:[#allocation7 + $0x1e0] sm:$0xff] }
 0x193   : > { %v499_v58 = vsel %vm393_vm2, %v498_v53, %v494_v56  ;;  %790 = vmatpush1.msra.mxu1 %v668_v26  ;;  %726 = vmatprep.subr.mxu0 %v597_v39  ;;  %v590_v53 = vld [vmem:[#allocation7 + $0x40] sm:$0xff]  ;;  %v653_v54 = vld [vmem:[#allocation7 + $0x238] sm:$0xff]  ;;  %v652_v56 = vld [vmem:[#allocation7 + $0x230] sm:$0xff] }
 0x194   : > { %v500_v59 = vsel %vm414_vm3, %v499_v58, %v480_v57  ;;  %791 = vmatprep.subr.mxu1 %v667_v28  ;;  %727 = vmatpush1.msra.mxu0 %v596_v41  ;;  %v589_v55 = vld [vmem:[#allocation7 + $0x38] sm:$0xff]  ;;  %v588_v57 = vld [vmem:[#allocation7 + $0x30] sm:$0xff]  ;;  %v651_v58 = vld [vmem:[#allocation7 + $0x228] sm:$0xff] }
 0x195   : > { %v502_v60 = vsel %vm417_vm4, %v500_v59, 0.0  ;;  %792 = vmatpush1.msra.mxu1 %v666_v16  ;;  %728 = vmatprep.subr.mxu0 %v595_v43  ;;  %v587_v59 = vld [vmem:[#allocation7 + $0x28] sm:$0xff]  ;;  %v641_v26 = vld [vmem:[#allocation7 + $0x1d8] sm:$0xff]  ;;  %v640_v28 = vld [vmem:[#allocation7 + $0x1d0] sm:$0xff] }
 0x196   : > { %503 = vadd.xlane.f32.xlu0 %v502_v60  ;;  %793 = vmatprep.subr.mxu1 %v665_v31  ;;  %v650_v60 = vld [vmem:[#allocation7 + $0x220] sm:$0xff]  ;;  %v639_v16 = vld [vmem:[#allocation7 + $0x1c8] sm:$0xff]  ;;  %v701_v31 = vld [vmem:[#allocation7 + $0x3b8] sm:$0xff] }
 0x197   : > { %794 = vmatpush1.msra.mxu1 %v664_v33  ;;  %729 = vmatpush1.msra.mxu0 %v594_v45  ;;  %v280_v36 = vld [vmem:[%s1606_s2] sm:$0x3] }
 0x198   : > { %795 = vmatprep.subr.mxu1 %v663_v35  ;;  %730 = vmatprep.subr.mxu0 %v593_v47 }
 0x199   : > { %796 = vmatpush1.msra.mxu1 %v662_v37  ;;  %731 = vmatpush1.msra.mxu0 %v592_v49  ;;  %v700_v49 = vld [vmem:[#allocation7 + $0x3b0] sm:$0xff] }
 0x19a   : > { %797 = vmatprep.subr.mxu1 %v661_v38  ;;  %732 = vmatprep.subr.mxu0 %v591_v51  ;;  %v699_v51 = vld [vmem:[#allocation7 + $0x3a8] sm:$0xff] }
 0x19b   : > { %798 = vmatpush1.msra.mxu1 %v660_v40  ;;  %733 = vmatpush1.msra.mxu0 %v590_v53  ;;  %v698_v53 = vld [vmem:[#allocation7 + $0x3a0] sm:$0xff] }
 0x19c   : > { %799 = vmatprep.subr.mxu1 %v659_v42  ;;  %734 = vmatprep.subr.mxu0 %v589_v55  ;;  %v697_v55 = vld [vmem:[#allocation7 + $0x398] sm:$0xff] }
 0x19d   : > { %800 = vmatpush1.msra.mxu1 %v658_v44  ;;  %735 = vmatpush1.msra.mxu0 %v588_v57  ;;  %v696_v57 = vld [vmem:[#allocation7 + $0x390] sm:$0xff] }
 0x19e   : > { %801 = vmatprep.subr.mxu1 %v657_v46  ;;  %736 = vmatprep.subr.mxu0 %v587_v59  ;;  %v695_v59 = vld [vmem:[#allocation7 + $0x388] sm:$0xff] }
 0x19f   : > { %802 = vmatpush1.msra.mxu1 %v656_v48  ;;  %737 = vmatpush1.msra.mxu0 %v586_v61  ;;  %v638_v48 = vld [vmem:[#allocation7 + $0x1c0] sm:$0xff] }
 0x1a0   : > { %803 = vmatprep.subr.mxu1 %v655_v50  ;;  %738 = vmatprep.subr.mxu0 %v585_v63  ;;  %v637_v50 = vld [vmem:[#allocation7 + $0x1b8] sm:$0xff]  ;;  %v694_v61 = vld [vmem:[#allocation7 + $0x380] sm:$0xff] }
 0x1a1   : > { %804 = vmatpush1.msra.mxu1 %v654_v52  ;;  %739 = vmatpush1.msra.mxu0 %v584_v7  ;;  %v636_v52 = vld [vmem:[#allocation7 + $0x1b0] sm:$0xff]  ;;  %v693_v63 = vld [vmem:[#allocation7 + $0x378] sm:$0xff] }
 0x1a2   : > { %805 = vmatprep.subr.mxu1 %v653_v54  ;;  %740 = vmatprep.subr.mxu0 %v583_v11  ;;  %v635_v54 = vld [vmem:[#allocation7 + $0x1a8] sm:$0xff]  ;;  %v692_v7 = vld [vmem:[#allocation7 + $0x370] sm:$0xff] }
 0x1a3   : > { %806 = vmatpush1.msra.mxu1 %v652_v56  ;;  %741 = vmatpush1.msra.mxu0 %v582_v13  ;;  %v634_v56 = vld [vmem:[#allocation7 + $0x1a0] sm:$0xff]  ;;  %v691_v11 = vld [vmem:[#allocation7 + $0x368] sm:$0xff] }
 0x1a4   : > { %807 = vmatprep.subr.mxu1 %v651_v58  ;;  %742 = vmatprep.subr.mxu0 %v645_v15  ;;  %v633_v58 = vld [vmem:[#allocation7 + $0x198] sm:$0xff]  ;;  %v690_v13 = vld [vmem:[#allocation7 + $0x360] sm:$0xff] }
 0x1a5   : > { %808 = vmatpush1.msra.mxu1 %v650_v60  ;;  %743 = vmatpush2.msra.mxu0 %v644_v20  ;;  %v632_v60 = vld [vmem:[#allocation7 + $0x190] sm:$0xff]  ;;  %v689_v15 = vld [vmem:[#allocation7 + $0x358] sm:$0xff]  ;;  %v626_v20 = vld [vmem:[#allocation7 + $0x160] sm:$0xff] }
 0x1a6   : > { %809 = vmatprep.subr.mxu1 %v649_v62  ;;  %744 = vmatprep.subr.mxu0 %v643_v22  ;;  %v631_v62 = vld [vmem:[#allocation7 + $0x188] sm:$0xff]  ;;  %v625_v22 = vld [vmem:[#allocation7 + $0x158] sm:$0xff] }
 0x1a7   : > { %810 = vmatpush1.msra.mxu1 %v648_v3  ;;  %745 = vmatpush2.msra.mxu0 %v642_v24  ;;  %v630_v3 = vld [vmem:[#allocation7 + $0x180] sm:$0xff]  ;;  %v624_v24 = vld [vmem:[#allocation7 + $0x150] sm:$0xff] }
 0x1a8   : > { %811 = vmatprep.subr.mxu1 %v647_v10  ;;  %746 = vmatprep.subr.mxu0 %v641_v26  ;;  %v629_v10 = vld [vmem:[#allocation7 + $0x178] sm:$0xff]  ;;  %v623_v26 = vld [vmem:[#allocation7 + $0x148] sm:$0xff] }
 0x1a9   : > { %812 = vmatpush1.msra.mxu1 %v646_v12  ;;  %747 = vmatpush2.msra.mxu0 %v640_v28  ;;  %v628_v12 = vld [vmem:[#allocation7 + $0x170] sm:$0xff]  ;;  %v622_v28 = vld [vmem:[#allocation7 + $0x140] sm:$0xff] }
 0x1aa   : > { %813 = vmatprep.subr.mxu1 %v709_v14  ;;  %748 = vmatprep.subr.mxu0 %v639_v16  ;;  %v627_v14 = vld [vmem:[#allocation7 + $0x168] sm:$0xff]  ;;  %v621_v16 = vld [vmem:[#allocation7 + $0x138] sm:$0xff] }
 0x1ab   : > { %814 = vmatpush2.msra.mxu1 %v708_v19  ;;  %749 = vmatpush2.msra.mxu0 %v638_v48 }
 0x1ac   : > { %815 = vmatprep.subr.mxu1 %v707_v21  ;;  %750 = vmatprep.subr.mxu0 %v637_v50  ;;  %v688_v21 = vld [vmem:[#allocation7 + $0x350] sm:$0xff] }
 0x1ad   : > { %816 = vmatpush2.msra.mxu1 %v706_v23  ;;  %751 = vmatpush2.msra.mxu0 %v636_v52  ;;  %v687_v23 = vld [vmem:[#allocation7 + $0x348] sm:$0xff] }
 0x1ae   : > { %817 = vmatprep.subr.mxu1 %v705_v25  ;;  %752 = vmatprep.subr.mxu0 %v635_v54  ;;  %v686_v25 = vld [vmem:[#allocation7 + $0x340] sm:$0xff] }
 0x1af   : > { %818 = vmatpush2.msra.mxu1 %v704_v27  ;;  %753 = vmatpush2.msra.mxu0 %v634_v56  ;;  %v685_v27 = vld [vmem:[#allocation7 + $0x338] sm:$0xff] }
 0x1b0   : > { %819 = vmatprep.subr.mxu1 %v703_v29  ;;  %754 = vmatprep.subr.mxu0 %v633_v58  ;;  %v684_v29 = vld [vmem:[#allocation7 + $0x330] sm:$0xff] }
 0x1b1   : > { %820 = vmatpush2.msra.mxu1 %v702_v30  ;;  %755 = vmatpush2.msra.mxu0 %v632_v60  ;;  %v683_v30 = vld [vmem:[#allocation7 + $0x328] sm:$0xff] }
 0x1b2   : > { %821 = vmatprep.subr.mxu1 %v701_v31  ;;  %756 = vmatprep.subr.mxu0 %v631_v62  ;;  %v620_v31 = vld [vmem:[#allocation7 + $0x130] sm:$0xff] }
 0x1b3   : > { %822 = vmatpush2.msra.mxu1 %v700_v49  ;;  %757 = vmatpush2.msra.mxu0 %v630_v3 }
 0x1b4   : > { %823 = vmatprep.subr.mxu1 %v699_v51  ;;  %758 = vmatprep.subr.mxu0 %v629_v10 }
 0x1b5   : > { %824 = vmatpush2.msra.mxu1 %v698_v53  ;;  %759 = vmatpush2.msra.mxu0 %v628_v12 }
 0x1b6   : > { %825 = vmatprep.subr.mxu1 %v697_v55  ;;  %760 = vmatprep.subr.mxu0 %v627_v14 }
 0x1b7   : > { %826 = vmatpush2.msra.mxu1 %v696_v57  ;;  %761 = vmatpush2.msra.mxu0 %v626_v20 }
 0x1b8   : > { %827 = vmatprep.subr.mxu1 %v695_v59  ;;  %762 = vmatprep.subr.mxu0 %v625_v22 }
 0x1b9   : > { %828 = vmatpush2.msra.mxu1 %v694_v61  ;;  %763 = vmatpush2.msra.mxu0 %v624_v24 }
 0x1ba   : > { %829 = vmatprep.subr.mxu1 %v693_v63  ;;  %764 = vmatprep.subr.mxu0 %v623_v26 }
 0x1bb   : > { %830 = vmatpush2.msra.mxu1 %v692_v7  ;;  %765 = vmatpush2.msra.mxu0 %v622_v28 }
 0x1bc   : > { %831 = vmatprep.subr.mxu1 %v691_v11  ;;  %766 = vmatprep.subr.mxu0 %v621_v16 }
 0x1bd   : > { %832 = vmatpush2.msra.mxu1 %v690_v13  ;;  %767 = vmatpush2.msra.mxu0 %v620_v31 }
 0x1be   : > { %833 = vmatprep.subr.mxu1 %v689_v15 }
 0x1bf   : > { %834 = vmatpush2.msra.mxu1 %v688_v21 }
 0x1c0   : > { %835 = vmatprep.subr.mxu1 %v687_v23 }
 0x1c1   : > { %836 = vmatpush2.msra.mxu1 %v686_v25 }
 0x1c2   : > { %837 = vmatprep.subr.mxu1 %v685_v27 }
 0x1c3   : > { %838 = vmatpush2.msra.mxu1 %v684_v29 }
 0x1c4   : > { %839 = vmatprep.subr.mxu1 %v683_v30 }
 0x21b   : > { %v420_v32 = vpop.xlane.xlu1 %419 }
 0x21c   : > { %v421_v34 = vmax.f32 %v420_v32, 0.0  ;;  %v682_v32 = vld [vmem:[#allocation7 + $0x320] sm:$0xff] }
 0x21d   : > { %840 = vmatpush2.msra.mxu1 %v682_v32 }
 0x21f   : > { %v504_v33 = vpop.xlane.xlu0 %503 }
 0x220   : > { %v505_v35 = vmax.f32 %v504_v33, 0.0  ;;  %v619_v33 = vld [vmem:[#allocation7 + $0x128] sm:$0xff] }
 0x221   : > { %768 = vmatprep.subr.mxu0 %v619_v33 }
 0x222   : > { %v506_v37 = vadd.f32 %v505_v35, %v421_v34  ;;  %v681_v34 = vld [vmem:[#allocation7 + $0x318] sm:$0xff]  ;;  %v618_v35 = vld [vmem:[#allocation7 + $0x120] sm:$0xff] }
 0x223   : > { %841 = vmatprep.subr.mxu1 %v681_v34  ;;  %769 = vmatpush2.msra.mxu0 %v618_v35 }
 0x224   : > { %v507_v17 = vmul.f32 %v506_v37, %v280_v36  ;;  %v680_v36 = vld [vmem:[#allocation7 + $0x310] sm:$0xff]  ;;  %v617_v37 = vld [vmem:[#allocation7 + $0x118] sm:$0xff] }
 0x225   : > { %842 = vmatpush2.msra.mxu1 %v680_v36  ;;  %770 = vmatprep.subr.mxu0 %v617_v37 }
 0x226   : > { %v508_v38 = vsel %vm417_vm4, %v507_v17, 0.0  ;;  %v679_v17 = vld [vmem:[#allocation7 + $0x308] sm:$0xff] }
 0x227   : > { %v509_v39 = vrot.slane %v508_v38, 4  ;;  %843 = vmatprep.subr.mxu1 %v679_v17 }
 0x229   : > { %v510_v40 = vadd.f32 %v509_v39, %v508_v38  ;;  %v616_v38 = vld [vmem:[#allocation7 + $0x110] sm:$0xff]  ;;  %v678_v39 = vld [vmem:[#allocation7 + $0x300] sm:$0xff] }
 0x22a   : > { %771 = vmatpush2.msra.mxu0 %v616_v38  ;;  %844 = vmatpush2.msra.mxu1 %v678_v39 }
 0x22b   : > { %v511_v41 = vrot.slane %v510_v40, 2 }
 0x22d   : > { %v512_v42 = vadd.f32 %v511_v41, %v510_v40  ;;  %v615_v40 = vld [vmem:[#allocation7 + $0x108] sm:$0xff]  ;;  %v614_v41 = vld [vmem:[#allocation7 + $0x100] sm:$0xff] }
 0x22e   : > { %772 = vmatprep.subr.mxu0 %v615_v40 }
 0x22f   : > { %v513_v43 = vrot.slane %v512_v42, 1  ;;  %773 = vmatpush2.msra.mxu0 %v614_v41 }
 0x231   : > { %v514_v44 = vadd.f32 %v513_v43, %v512_v42 }
 0x233   : > { %v1007_v45 = vmul.f32 -1.442695, %v514_v44 }
 0x235   : > { %1091 = vpow2.f32 %v1007_v45 }
 0x242   : > { %v1092_v46 = vpop.eup %1091 }
 0x243   : > { %v518_v47 = vadd.f32 1.0, %v1092_v46 }
 0x245   : > { %1093 = vrcp.f32 %v518_v47 }
 0x252   : > { %v1094_v19 = vpop.eup %1093 }
 0x253   : > { %526 = vbcast.lane.b32.xlu1 %v1094_v19, 264  ;;  %522 = vbcast.lane.b32.xlu0 %v1094_v19, 256 }
 0x257   : > { %530 = vbcast.lane.b32.xlu1 %v1094_v19, 272  ;;  %534 = vbcast.lane.b32.xlu0 %v1094_v19, 280 }
 0x2c5   : > { %v527_v42 = vpop.permute.xlu1 %526  ;;  %v523_v43 = vpop.permute.xlu0 %522 }
 0x2c6   : > { %v1504_v44 = vmul.f32 %v527_v42, %v1454_v8  ;;  %v1507_v45 = vmul.f32 %v527_v42, %v1456_v9  ;;  %v1510_v46 = vmul.f32 %v523_v43, %v1442_v2  ;;  %v1513_v47 = vmul.f32 %v523_v43, %v1446_v4 }
 0x2c8   : > { %v544_v48 = vadd.f32 %v1504_v44, %v1510_v46  ;;  %v553_v49 = vadd.f32 %v1507_v45, %v1513_v47 }
 0x2c9   : > { %v531_v50 = vpop.permute.xlu1 %530  ;;  %v535_v51 = vpop.permute.xlu0 %534 }
 0x2ca   : > { %v1520_v8 = vmul.f32 %v531_v50, %v1438_v0  ;;  %v1523_v9 = vmul.f32 %v531_v50, %v1440_v1  ;;  %v1526_v2 = vmul.f32 %v535_v51, %v1448_v5  ;;  %v1529_v4 = vmul.f32 %v535_v51, %v1450_v6 }
 0x2cc   : > { %v545_v52 = vadd.f32 %v544_v48, %v1520_v8  ;;  %v554_v53 = vadd.f32 %v553_v49, %v1523_v9  ;;  %v564_v54 = vmax.f32 %v1510_v46, %v1520_v8  ;;  %v573_v0 = vmax.f32 %v1513_v47, %v1523_v9 }
 0x2cd   : > { %v565_v1 = vmax.f32 %v1504_v44, %v1526_v2  ;;  %v574_v5 = vmax.f32 %v1507_v45, %v1529_v4 }
 0x2ce   : > { %v546_v55 = vadd.f32 %v545_v52, %v1526_v2  ;;  %v555_v6 = vadd.f32 %v554_v53, %v1529_v4 }
 0x2cf   : > { %v566_v56 = vmax.f32 %v564_v54, %v565_v1  ;;  %v575_v57 = vmax.f32 %v573_v0, %v574_v5 }
 0x2d0   : > { %v547_v58 = vrot.slane %v546_v55, 4  ;;  %v556_v59 = vrot.slane %v555_v6, 4 }
 0x2d1   : > { %v567_v60 = vrot.slane %v566_v56, 4  ;;  %v576_v61 = vrot.slane %v575_v57, 4 }
 0x2d2   : > { %v548_v62 = vadd.f32 %v547_v58, %v546_v55  ;;  %v557_v63 = vadd.f32 %v556_v59, %v555_v6 }
 0x2d3   : > { %v577_v3 = vmax.f32 %v575_v57, %v576_v61  ;;  %v568_v7 = vmax.f32 %v566_v56, %v567_v60 }
 0x2d4   : > { %v558_v10 = vrot.slane %v557_v63, 2  ;;  %v549_v11 = vrot.slane %v548_v62, 2 }
 0x2d5   : > { %v578_v12 = vrot.slane %v577_v3, 2  ;;  %v569_v13 = vrot.slane %v568_v7, 2 }
 0x2d6   : > { %v559_v14 = vadd.f32 %v558_v10, %v557_v63  ;;  %v550_v15 = vadd.f32 %v549_v11, %v548_v62 }
 0x2d7   : > { %v579_v19 = vmax.f32 %v577_v3, %v578_v12  ;;  %v570_v20 = vmax.f32 %v568_v7, %v569_v13 }
 0x2d8   : > { %v560_v21 = vrot.slane %v559_v14, 1  ;;  %v551_v22 = vrot.slane %v550_v15, 1 }
 0x2d9   : > { %v580_v23 = vrot.slane %v579_v19, 1  ;;  %v571_v24 = vrot.slane %v570_v20, 1 }
 0x2da   : > { %v561_v25 = vadd.f32 %v560_v21, %v559_v14  ;;  %v552_v26 = vadd.f32 %v551_v22, %v550_v15 }
 0x2db   : > { %v581_v27 = vmax.f32 %v579_v19, %v580_v23  ;;  %v572_v28 = vmax.f32 %v570_v20, %v571_v24 }
 0x2dc   : > { %v563_v29 = vmul.f32 0.03125, %v561_v25  ;;  %v562_v16 = vmul.f32 0.03125, %v552_v26 }
 0x2dd   : > { %845 = vmatprep.mubr.f32.mxu1 %v581_v27 }
 0x2de   : > { %846 = vmatmul.mubr.f32.vlgmr.msra.gmra.mxu1 %v572_v28  ;;  %774 = vmatprep.mubr.f32.mxu0 %v563_v29 }
 0x2df   : > { %775 = vmatmul.mubr.f32.vlgmr.msra.gmra.mxu0 %v562_v16 }
 0x39e   : > { %v847_v30 = vpop.f32.mrf.mxu1 }
 0x39f   : > { %v776_v31 = vpop.f32.mrf.mxu0 }
 0x3a0   : > { %v848_v32 = vadd.f32 %v847_v30, %v776_v31  ;;  %v849_v33 = vpop.f32.mrf.mxu1 }
 0x3a1   : > { %v778_v34 = vpop.f32.mrf.mxu0 }
 0x3a2   : > { %v1008_v35 = vmul.f32 -1.442695, %v848_v32  ;;  %v850_v36 = vadd.f32 %v849_v33, %v778_v34 }
 0x3a4   : > { %1095 = vpow2.f32 %v1008_v35  ;;  %v1009_v37 = vmul.f32 -1.442695, %v850_v36 }
 0x3a6   : > { %1097 = vpow2.f32 %v1009_v37 }
 0x3b1   : > { %v1096_v17 = vpop.eup %1095 }
 0x3b2   : > { %v858_v38 = vadd.f32 1.0, %v1096_v17 }
 0x3b3   : > { %v1098_v39 = vpop.eup %1097 }
 0x3b4   : > { %1099 = vrcp.f32 %v858_v38  ;;  %v859_v40 = vadd.f32 1.0, %v1098_v39 }
 0x3b6   : > { %1101 = vrcp.f32 %v859_v40 }
 0x3c1   : > { %v1100_v41 = vpop.eup %1099 }
 0x3c2   : > { %v867_v42 = vrot.slane %v1100_v41, %v1474_v18 }
 0x3c3   : > { %v1102_v43 = vpop.eup %1101 }
 0x3c4   : > { %v872_v48 = vmul.f32 %v867_v42, %v1510_v46  ;;  %v874_v49 = vmul.f32 %v867_v42, %v1504_v44  ;;  %v876_v50 = vmul.f32 %v867_v42, %v1520_v8  ;;  %v878_v51 = vmul.f32 %v867_v42, %v1526_v2 }
 0x3c5   : > { %v871_v52 = vrot.slane %v1102_v43, %v1474_v18 }
 0x3c6   : > { %880 = vst [vmem:[%s242_s22] sm:$0xff] %v872_v48  ;;  %882 = vst [vmem:[%s242_s22 + $0x10] sm:$0xff] %v874_v49 }
 0x3c7   : > { %884 = vst [vmem:[%s242_s22 + $0x20] sm:$0xff] %v876_v50  ;;  %886 = vst [vmem:[%s242_s22 + $0x30] sm:$0xff] %v878_v51  ;;  %v873_v44 = vmul.f32 %v871_v52, %v1513_v47  ;;  %v875_v46 = vmul.f32 %v871_v52, %v1507_v45  ;;  %v877_v18 = vmul.f32 %v871_v52, %v1523_v9 }
 0x3c8   : > { %v879_v8 = vmul.f32 %v871_v52, %v1529_v4 }
 0x3c9   : > { %881 = vst [vmem:[%s242_s22 + $0x8] sm:$0xff] %v873_v44  ;;  %883 = vst [vmem:[%s242_s22 + $0x18] sm:$0xff] %v875_v46 }
 0x3ca   : > { %885 = vst [vmem:[%s242_s22 + $0x28] sm:$0xff] %v877_v18  ;;  %887 = vst [vmem:[%s242_s22 + $0x38] sm:$0xff] %v879_v8 }
 0x3cb   : > { %1196 = shalt.err (!%p1193_p12)
}
 0x3cc   : > { %s1197_s10 = scalar_lea.hbm %s1555_s6, 1024  ;;  %s1201_s23 = scalar_lea.hbm %s1608_s4, 2048 }
 0x3cd   : > { %p1198_p6 = scmp.ne.s32.totalorder %s1555_s6, %s1197_s10  ;;  %p1202_p13 = scmp.lt.s32.totalorder %s1555_s6, %s1608_s4 }
 0x3ce   : > { %p1203_p3 = scmp.lt.s32.totalorder %s1201_s23, %s1197_s10 }
 0x3cf   : > { %p1199_p7 = pnand %p1198_p6, %p1627_p0 }
 0x3d0   : > { %p1204_p8 = por %p1203_p3, %p1202_p13 }
 0x3d1   : > { %p1200_p11 = pneg %p1199_p7 }
 0x3d3   : > { %p1205_p2 = pnand %p1204_p8, %p1200_p11 }
 0x3d5   : > { %1208 = shalt.err (!%p1205_p2)
}
 0x3d6   : > { %s1260_s29 = smov 256   ;;  %s1261_s20 = smov 16  }
 0x3d7   : > { %1027 = dma.vmem_to_hbm [thread:$0]  (%p1627_p0), %s1557_s11, 1024, %s1555_s6, %s889_s25, %s1260_s29, %s1260_s29, %s1261_s20  }
 0x3d8 PF: > { %s917_s22 = sand.u32 1, %s1239_s15   ;;  %p1628_p4 = scmp.ne.s32.totalorder %s1617_s28, 0 }
 0x3d9   : > { %p1629_p5 = scmp.ge.s32.totalorder %s1251_s18, 2  ;;  %s918_s19 = scalar_lea.sflag [#allocation4], %s917_s22 }
 0x3db   : > { %p1041_p9 = pnand %p1629_p5, %p1628_p4 }
 0x3dd   : > { %p1042_p10 = pneg %p1041_p9 }
 0x3df   : > { %1234 = dma.done.wait (%p1042_p10), %s918_s19, 1024  }
 0x3e0   : > { %1236 = vsyncadd (%p1042_p10), %s918_s19, 4294966272  ;;  %p18_p1 = scmp.ge.s32.totalorder %s1312_s21, 4   ;;  %s1630_s15 = smov %s1243_s16 }
 0x3e1   : > { %s1631_s16 = smov %s1247_s17  ;;  %s1632_s17 = smov %s1324_s24 }
 0x3e2   : > { %s1633_s18 = smov %s1312_s21  ;;  %20 = sbr.rel (!%p18_p1) target bundleno = 8 (0x8), region = 89 }
 0x3e7   :  { %923 = vsyncpa [#allocation3], 1 }
 0x3e8   :  { %925 = vsyncpa [#allocation3 + $0x1], 1 }
 0x3e9   :  { %926 = vsyncpa [#allocation6], 1 }
 0x3ea   :  { %927 = vsyncpa [#allocation4], 1 }
 0x3eb   :  { %929 = vsyncpa [#allocation4 + $0x1], 1 }

</bundles_post_ra>
